<compile_context>
chip_gen: v7x
topology: tpu7x:2x2x1
jax: 0.10.0
libtpu: 0.0.40
codegen_flags: <defaults>
</compile_context>

<pallas_src>
import functools

import jax
import jax.numpy as jnp
from jax.experimental import pallas as pl
from jax.experimental.pallas import tpu as pltpu

_LANES = 128  # class dim padded to one full lane group per branch -> lane-dense stores


# ---------------------------------------------------------------------------
# Kernel
# ---------------------------------------------------------------------------
def _window_sums(x_ref, kern):
    """Stacked per-tap window sums S[(ki,kj,ic)] for a stride-1 VALID conv, shape (N, k*k*Cin)."""
    _, h, w, _ = x_ref.shape
    ho, wo = h - kern + 1, w - kern + 1
    pieces = []
    for ki in range(kern):
        # One H-window row-sum per ki, reused for every kj (cuts VPU adds ~k x).
        rowsum = jnp.sum(x_ref[:, ki:ki + ho, :, :].astype(jnp.float32), axis=1)   # (N, W, C)
        for kj in range(kern):
            pieces.append(jnp.sum(rowsum[:, kj:kj + wo, :], axis=1))               # (N, C)
    return jnp.concatenate(pieces, axis=-1)                                         # (N, k*k*C)


def _fused_branches_kernel(x2_ref, x3_ref, w2_ref, b2_ref, w3_ref, b3_ref,
                           out_ref, *, k2, k3):
    """Both branches fused: conv + global-avg-pool + fc folded into one matmul each."""

    def one_branch(x_ref, w_ref, b_ref, kern):
        s = _window_sums(x_ref, kern)                                   # (N, k*k*Cin) f32
        acc = jnp.dot(s.astype(jnp.bfloat16), w_ref[...],               # bf16 MXU, f32 accumulate
                      preferred_element_type=jnp.float32)               # (N, 128)
        return acc + b_ref[0, :].astype(jnp.float32)

    r2 = one_branch(x2_ref, w2_ref, b2_ref, k2)                         # (N, 128)
    r3 = one_branch(x3_ref, w3_ref, b3_ref, k3)                         # (N, 128)
    out_ref[...] = jnp.concatenate([r2, r3], axis=-1).astype(out_ref.dtype)  # single full-width store


def fused_branch_forward(fmap2, fmap3, p2, p3, *, tile_n=256):
    """One pallas_call evaluating both branches. Returns an (N, 2*128) slab (padded classes)."""
    n = fmap2.shape[0]
    assert fmap3.shape[0] == n
    w2, b2, k2 = p2
    w3, b3, k3 = p3

    tile_n = min(n, tile_n)
    grid = (pl.cdiv(n, tile_n),)

    def fmap_spec(shape):
        return pl.BlockSpec((tile_n,) + tuple(shape[1:]), lambda i: (i, 0, 0, 0))

    def const2d(shape):
        return pl.BlockSpec(tuple(shape), lambda i: (0, 0))

    kernel = functools.partial(_fused_branches_kernel, k2=k2, k3=k3)
    return pl.pallas_call(
        kernel,
        out_shape=jax.ShapeDtypeStruct((n, 2 * _LANES), jnp.float32),
        grid_spec=pltpu.PrefetchScalarGridSpec(
            num_scalar_prefetch=0,
            grid=grid,
            in_specs=[fmap_spec(fmap2.shape), fmap_spec(fmap3.shape),
                      const2d(w2.shape), const2d(b2.shape),
                      const2d(w3.shape), const2d(b3.shape)],
            out_specs=pl.BlockSpec((tile_n, 2 * _LANES), lambda i: (i, 0)),
        ),
        compiler_params=pltpu.CompilerParams(
            dimension_semantics=("parallel",)),
    )(fmap2, fmap3, w2, b2, w3, b3)


# ---------------------------------------------------------------------------
# Parameters (init + folding)
# ---------------------------------------------------------------------------
def _init_branch(key, in_filters, n_classes, kern):
    k0, k1, k2, k3 = jax.random.split(key, 4)
    conv_w = 0.02 * jax.random.normal(k0, (kern, kern, in_filters, in_filters), jnp.float32)
    conv_b = 0.1 * jax.random.normal(k1, (in_filters,), jnp.float32)
    fc_w = 0.05 * jax.random.normal(k2, (in_filters, n_classes), jnp.float32)
    fc_b = 0.1 * jax.random.normal(k3, (n_classes,), jnp.float32)
    return conv_w, conv_b, fc_w, fc_b


def _fold_branch_params(conv_w, conv_b, fc_w, fc_b, h, w):
    """Fold conv bias + avg-pool scale + FC into one (k*k*Cin, 128) bf16 matrix + f32 bias.

    Exact linear reassociation: valid only because the branch has no nonlinearity
    between conv, pool and fc.
    """
    k = conv_w.shape[0]
    cin = conv_w.shape[2]
    ho, wo = h - k + 1, w - k + 1
    n_classes = fc_w.shape[1]

    w_eff = (conv_w.reshape(k * k * cin, -1) @ fc_w) * (1.0 / float(ho * wo))   # (k*k*Cin, nc)
    b_eff = conv_b @ fc_w + fc_b                                                # (nc,)

    w_pad = jnp.zeros((k * k * cin, _LANES), jnp.float32).at[:, :n_classes].set(w_eff)
    b_pad = jnp.zeros((1, _LANES), jnp.float32).at[0, :n_classes].set(b_eff)
    return w_pad.astype(jnp.bfloat16), b_pad, k


class ResNet18BranchPallas:
    """JAX/Pallas port of ResNet18Branch (forward path only)."""

    def __init__(self, classes, key):
        self.classes = classes
        self.n_classes = len(classes)
        kb2, kb3 = jax.random.split(key)
        # b2 = Branch(128, n_classes, kern_size=3); b3 = Branch(256, n_classes, kern_size=2)
        self.b2_params = _init_branch(kb2, 128, self.n_classes, kern=3)
        self.b3_params = _init_branch(kb3, 256, self.n_classes, kern=2)
        self._folded = {}  # keyed by feature-map spatial size (pool scale depends on it)

    def _get_folded(self, shape2, shape3):
        key = (shape2[1], shape2[2], shape3[1], shape3[2])
        if key not in self._folded:
            p2 = _fold_branch_params(*self.b2_params, shape2[1], shape2[2])
            p3 = _fold_branch_params(*self.b3_params, shape3[1], shape3[2])
            self._folded[key] = (p2, p3)
        return self._folded[key]

    def forward(self, fmaps):
        # fmaps = (128-ch feature map, 256-ch feature map, trunk logits), mirroring
        # the assertion len(self.branches) == len(fmaps) - 1 in the PyTorch code.
        assert len(fmaps) - 1 == 2
        fmap2, fmap3, trunk_logits = fmaps
        p2, p3 = self._get_folded(fmap2.shape, fmap3.shape)
        out = fused_branch_forward(fmap2, fmap3, p2, p3)
        nc = self.n_classes
        return [out[:, :nc], out[:, _LANES:_LANES + nc], trunk_logits]


# ---------------------------------------------------------------------------
# Pure-JAX reference & test
# ---------------------------------------------------------------------------
def _branch_ref(x, conv_w, conv_b, fc_w, fc_b):
    y = jax.lax.conv_general_dilated(
        x, conv_w, window_strides=(1, 1), padding="VALID",
        dimension_numbers=("NHWC", "HWIO", "NHWC"))
    y = y + conv_b
    y = jnp.mean(y, axis=(1, 2))
    return y @ fc_w + fc_b


if __name__ == "__main__":
    classes = [f"class_{i}" for i in range(10)]
    n_classes = len(classes)

    key = jax.random.PRNGKey(0)
    k_model, k_f2, k_f3, k_logits = jax.random.split(key, 4)

    model = ResNet18BranchPallas(classes, k_model)

    # Small trunk feature maps consistent with the branch channel counts
    # (CIFAR ResNet18: 128ch@8x8, 256ch@4x4, trunk logits (N, n_classes)).
    batch = 2
    fmap2 = 0.1 * jax.random.normal(k_f2, (batch, 8, 8, 128), jnp.float32)
    fmap3 = 0.1 * jax.random.normal(k_f3, (batch, 4, 4, 256), jnp.float32)
    trunk_logits = jax.random.normal(k_logits, (batch, n_classes), jnp.float32)

    preds = model.forward((fmap2, fmap3, trunk_logits))
    preds = [jax.block_until_ready(p) for p in preds]

    assert preds[0].shape == (batch, n_classes)
    assert preds[1].shape == (batch, n_classes)
    assert preds[2].shape == (batch, n_classes)

    # Correctness check against a pure-JAX (unfolded, f32) reference.
    ref0 = _branch_ref(fmap2, *model.b2_params)
    ref1 = _branch_ref(fmap3, *model.b3_params)
    assert jnp.allclose(preds[0], ref0, rtol=3e-2, atol=3e-2), "branch b2 mismatch"
    assert jnp.allclose(preds[1], ref1, rtol=3e-2, atol=3e-2), "branch b3 mismatch"
    assert jnp.array_equal(preds[2], trunk_logits)

    print("KERNEL_OK")
</pallas_src>

<mosaic_0001>
module attributes {stable_mosaic.version = 11 : i64} {
  func.func @_fused_branches_kernel(%arg0: i32, %arg1: memref<2x8x8x128xf32, #tpu.memory_space<vmem>>, %arg2: memref<2x4x4x256xf32, #tpu.memory_space<vmem>>, %arg3: memref<1152x128xbf16, #tpu.memory_space<vmem>>, %arg4: memref<1x128xf32, #tpu.memory_space<vmem>>, %arg5: memref<1024x128xbf16, #tpu.memory_space<vmem>>, %arg6: memref<1x128xf32, #tpu.memory_space<vmem>>, %arg7: memref<2x256xf32, #tpu.memory_space<vmem>>) attributes {dimension_semantics = [#tpu.dimension_semantics<parallel>], iteration_bounds = array<i64: 1>, scalar_prefetch = 0 : i64, scratch_operands = 0 : i64, tpu.core_type = #tpu.core_type<tc>, window_params = [{transform_indices = @transform_0, window_bounds = array<i64: 2, 8, 8, 128>}, {transform_indices = @transform_1, window_bounds = array<i64: 2, 4, 4, 256>}, {pipeline_mode = #tpu.pipeline_mode<synchronous>, transform_indices = @transform_2, window_bounds = array<i64: 1152, 128>}, {pipeline_mode = #tpu.pipeline_mode<synchronous>, transform_indices = @transform_3, window_bounds = array<i64: 1, 128>}, {pipeline_mode = #tpu.pipeline_mode<synchronous>, transform_indices = @transform_4, window_bounds = array<i64: 1024, 128>}, {pipeline_mode = #tpu.pipeline_mode<synchronous>, transform_indices = @transform_5, window_bounds = array<i64: 1, 128>}, {transform_indices = @transform_6, window_bounds = array<i64: 2, 256>}]} {
    %c0 = arith.constant 0 : index
    %c0_0 = arith.constant 0 : index
    %c0_1 = arith.constant 0 : index
    %c0_2 = arith.constant 0 : index
    %0 = vector.load %arg1[%c0, %c0_0, %c0_1, %c0_2] : memref<2x8x8x128xf32, #tpu.memory_space<vmem>>, vector<2x6x8x128xf32>
    %cst = arith.constant dense<0.000000e+00> : vector<2x8x128xf32>
    %1 = vector.multi_reduction <add>, %0, %cst [1] : vector<2x6x8x128xf32> to vector<2x8x128xf32>
    %2 = vector.extract_strided_slice %1 {offsets = [0, 0, 0], sizes = [2, 6, 128], strides = [1, 1, 1]} : vector<2x8x128xf32> to vector<2x6x128xf32>
    %cst_3 = arith.constant dense<0.000000e+00> : vector<2x128xf32>
    %3 = vector.multi_reduction <add>, %2, %cst_3 [1] : vector<2x6x128xf32> to vector<2x128xf32>
    %4 = vector.extract_strided_slice %1 {offsets = [0, 1, 0], sizes = [2, 6, 128], strides = [1, 1, 1]} : vector<2x8x128xf32> to vector<2x6x128xf32>
    %cst_4 = arith.constant dense<0.000000e+00> : vector<2x128xf32>
    %5 = vector.multi_reduction <add>, %4, %cst_4 [1] : vector<2x6x128xf32> to vector<2x128xf32>
    %6 = vector.extract_strided_slice %1 {offsets = [0, 2, 0], sizes = [2, 6, 128], strides = [1, 1, 1]} : vector<2x8x128xf32> to vector<2x6x128xf32>
    %cst_5 = arith.constant dense<0.000000e+00> : vector<2x128xf32>
    %7 = vector.multi_reduction <add>, %6, %cst_5 [1] : vector<2x6x128xf32> to vector<2x128xf32>
    %c0_6 = arith.constant 0 : index
    %c1 = arith.constant 1 : index
    %c0_7 = arith.constant 0 : index
    %c0_8 = arith.constant 0 : index
    %8 = vector.load %arg1[%c0_6, %c1, %c0_7, %c0_8] : memref<2x8x8x128xf32, #tpu.memory_space<vmem>>, vector<2x6x8x128xf32>
    %cst_9 = arith.constant dense<0.000000e+00> : vector<2x8x128xf32>
    %9 = vector.multi_reduction <add>, %8, %cst_9 [1] : vector<2x6x8x128xf32> to vector<2x8x128xf32>
    %10 = vector.extract_strided_slice %9 {offsets = [0, 0, 0], sizes = [2, 6, 128], strides = [1, 1, 1]} : vector<2x8x128xf32> to vector<2x6x128xf32>
    %cst_10 = arith.constant dense<0.000000e+00> : vector<2x128xf32>
    %11 = vector.multi_reduction <add>, %10, %cst_10 [1] : vector<2x6x128xf32> to vector<2x128xf32>
    %12 = vector.extract_strided_slice %9 {offsets = [0, 1, 0], sizes = [2, 6, 128], strides = [1, 1, 1]} : vector<2x8x128xf32> to vector<2x6x128xf32>
    %cst_11 = arith.constant dense<0.000000e+00> : vector<2x128xf32>
    %13 = vector.multi_reduction <add>, %12, %cst_11 [1] : vector<2x6x128xf32> to vector<2x128xf32>
    %14 = vector.extract_strided_slice %9 {offsets = [0, 2, 0], sizes = [2, 6, 128], strides = [1, 1, 1]} : vector<2x8x128xf32> to vector<2x6x128xf32>
    %cst_12 = arith.constant dense<0.000000e+00> : vector<2x128xf32>
    %15 = vector.multi_reduction <add>, %14, %cst_12 [1] : vector<2x6x128xf32> to vector<2x128xf32>
    %c0_13 = arith.constant 0 : index
    %c2 = arith.constant 2 : index
    %c0_14 = arith.constant 0 : index
    %c0_15 = arith.constant 0 : index
    %16 = vector.load %arg1[%c0_13, %c2, %c0_14, %c0_15] : memref<2x8x8x128xf32, #tpu.memory_space<vmem>>, vector<2x6x8x128xf32>
    %cst_16 = arith.constant dense<0.000000e+00> : vector<2x8x128xf32>
    %17 = vector.multi_reduction <add>, %16, %cst_16 [1] : vector<2x6x8x128xf32> to vector<2x8x128xf32>
    %18 = vector.extract_strided_slice %17 {offsets = [0, 0, 0], sizes = [2, 6, 128], strides = [1, 1, 1]} : vector<2x8x128xf32> to vector<2x6x128xf32>
    %cst_17 = arith.constant dense<0.000000e+00> : vector<2x128xf32>
    %19 = vector.multi_reduction <add>, %18, %cst_17 [1] : vector<2x6x128xf32> to vector<2x128xf32>
    %20 = vector.extract_strided_slice %17 {offsets = [0, 1, 0], sizes = [2, 6, 128], strides = [1, 1, 1]} : vector<2x8x128xf32> to vector<2x6x128xf32>
    %cst_18 = arith.constant dense<0.000000e+00> : vector<2x128xf32>
    %21 = vector.multi_reduction <add>, %20, %cst_18 [1] : vector<2x6x128xf32> to vector<2x128xf32>
    %22 = vector.extract_strided_slice %17 {offsets = [0, 2, 0], sizes = [2, 6, 128], strides = [1, 1, 1]} : vector<2x8x128xf32> to vector<2x6x128xf32>
    %cst_19 = arith.constant dense<0.000000e+00> : vector<2x128xf32>
    %23 = vector.multi_reduction <add>, %22, %cst_19 [1] : vector<2x6x128xf32> to vector<2x128xf32>
    %24 = tpu.concatenate %3, %5, %7, %11, %13, %15, %19, %21, %23 in 1 : vector<2x128xf32>, vector<2x128xf32>, vector<2x128xf32>, vector<2x128xf32>, vector<2x128xf32>, vector<2x128xf32>, vector<2x128xf32>, vector<2x128xf32>, vector<2x128xf32> -> vector<2x1152xf32>
    %25 = arith.truncf %24 : vector<2x1152xf32> to vector<2x1152xbf16>
    %c0_20 = arith.constant 0 : index
    %c0_21 = arith.constant 0 : index
    %26 = vector.load %arg3[%c0_20, %c0_21] : memref<1152x128xbf16, #tpu.memory_space<vmem>>, vector<1152x128xbf16>
    %cst_22 = arith.constant dense<0.000000e+00> : vector<2x128xf32>
    %27 = tpu.matmul %25, %26, %cst_22 {dimension_numbers = #tpu.dot_dimension_numbers<[1], [0], [0], [1], [0, 0, 1, 1], [], []>} : vector<2x1152xbf16>, vector<1152x128xbf16>, vector<2x128xf32> -> vector<2x128xf32>
    %c0_23 = arith.constant 0 : index
    %c0_24 = arith.constant 0 : index
    %28 = vector.load %arg4[%c0_23, %c0_24] : memref<1x128xf32, #tpu.memory_space<vmem>>, vector<1x128xf32>
    %29 = vector.shape_cast %28 : vector<1x128xf32> to vector<128xf32>
    %30 = vector.shape_cast %29 : vector<128xf32> to vector<1x128xf32>
    %31 = vector.broadcast %30 : vector<1x128xf32> to vector<2x128xf32>
    %32 = arith.addf %27, %31 : vector<2x128xf32>
    %c0_25 = arith.constant 0 : index
    %c0_26 = arith.constant 0 : index
    %c0_27 = arith.constant 0 : index
    %c0_28 = arith.constant 0 : index
    %33 = vector.load %arg2[%c0_25, %c0_26, %c0_27, %c0_28] : memref<2x4x4x256xf32, #tpu.memory_space<vmem>>, vector<2x3x4x256xf32>
    %cst_29 = arith.constant dense<0.000000e+00> : vector<2x4x256xf32>
    %34 = vector.multi_reduction <add>, %33, %cst_29 [1] : vector<2x3x4x256xf32> to vector<2x4x256xf32>
    %35 = vector.extract_strided_slice %34 {offsets = [0, 0, 0], sizes = [2, 3, 256], strides = [1, 1, 1]} : vector<2x4x256xf32> to vector<2x3x256xf32>
    %cst_30 = arith.constant dense<0.000000e+00> : vector<2x256xf32>
    %36 = vector.multi_reduction <add>, %35, %cst_30 [1] : vector<2x3x256xf32> to vector<2x256xf32>
    %37 = vector.extract_strided_slice %34 {offsets = [0, 1, 0], sizes = [2, 3, 256], strides = [1, 1, 1]} : vector<2x4x256xf32> to vector<2x3x256xf32>
    %cst_31 = arith.constant dense<0.000000e+00> : vector<2x256xf32>
    %38 = vector.multi_reduction <add>, %37, %cst_31 [1] : vector<2x3x256xf32> to vector<2x256xf32>
    %c0_32 = arith.constant 0 : index
    %c1_33 = arith.constant 1 : index
    %c0_34 = arith.constant 0 : index
    %c0_35 = arith.constant 0 : index
    %39 = vector.load %arg2[%c0_32, %c1_33, %c0_34, %c0_35] : memref<2x4x4x256xf32, #tpu.memory_space<vmem>>, vector<2x3x4x256xf32>
    %cst_36 = arith.constant dense<0.000000e+00> : vector<2x4x256xf32>
    %40 = vector.multi_reduction <add>, %39, %cst_36 [1] : vector<2x3x4x256xf32> to vector<2x4x256xf32>
    %41 = vector.extract_strided_slice %40 {offsets = [0, 0, 0], sizes = [2, 3, 256], strides = [1, 1, 1]} : vector<2x4x256xf32> to vector<2x3x256xf32>
    %cst_37 = arith.constant dense<0.000000e+00> : vector<2x256xf32>
    %42 = vector.multi_reduction <add>, %41, %cst_37 [1] : vector<2x3x256xf32> to vector<2x256xf32>
    %43 = vector.extract_strided_slice %40 {offsets = [0, 1, 0], sizes = [2, 3, 256], strides = [1, 1, 1]} : vector<2x4x256xf32> to vector<2x3x256xf32>
    %cst_38 = arith.constant dense<0.000000e+00> : vector<2x256xf32>
    %44 = vector.multi_reduction <add>, %43, %cst_38 [1] : vector<2x3x256xf32> to vector<2x256xf32>
    %45 = tpu.concatenate %36, %38, %42, %44 in 1 : vector<2x256xf32>, vector<2x256xf32>, vector<2x256xf32>, vector<2x256xf32> -> vector<2x1024xf32>
    %46 = arith.truncf %45 : vector<2x1024xf32> to vector<2x1024xbf16>
    %c0_39 = arith.constant 0 : index
    %c0_40 = arith.constant 0 : index
    %47 = vector.load %arg5[%c0_39, %c0_40] : memref<1024x128xbf16, #tpu.memory_space<vmem>>, vector<1024x128xbf16>
    %cst_41 = arith.constant dense<0.000000e+00> : vector<2x128xf32>
    %48 = tpu.matmul %46, %47, %cst_41 {dimension_numbers = #tpu.dot_dimension_numbers<[1], [0], [0], [1], [0, 0, 1, 1], [], []>} : vector<2x1024xbf16>, vector<1024x128xbf16>, vector<2x128xf32> -> vector<2x128xf32>
    %c0_42 = arith.constant 0 : index
    %c0_43 = arith.constant 0 : index
    %49 = vector.load %arg6[%c0_42, %c0_43] : memref<1x128xf32, #tpu.memory_space<vmem>>, vector<1x128xf32>
    %50 = vector.shape_cast %49 : vector<1x128xf32> to vector<128xf32>
    %51 = vector.shape_cast %50 : vector<128xf32> to vector<1x128xf32>
    %52 = vector.broadcast %51 : vector<1x128xf32> to vector<2x128xf32>
    %53 = arith.addf %48, %52 : vector<2x128xf32>
    %54 = tpu.concatenate %32, %53 in 1 : vector<2x128xf32>, vector<2x128xf32> -> vector<2x256xf32>
    %c0_44 = arith.constant 0 : index
    %c0_45 = arith.constant 0 : index
    %55 = vector.load %arg7[%c0_44, %c0_45] : memref<2x256xf32, #tpu.memory_space<vmem>>, vector<2x256xf32>
    tpu.vector_store %arg7[%c0_44, %c0_45], %54 {strides = array<i32>} : memref<2x256xf32, #tpu.memory_space<vmem>>, vector<2x256xf32>,
    return
  }
  func.func @transform_0(%arg0: i32) -> (i32, i32, i32, i32) {
    %c0_i32 = arith.constant 0 : i32
    %c0_i32_0 = arith.constant 0 : i32
    %c0_i32_1 = arith.constant 0 : i32
    %c0_i32_2 = arith.constant 0 : i32
    return %arg0, %c0_i32, %c0_i32_0, %c0_i32_1 : i32, i32, i32, i32
  }
  func.func @transform_1(%arg0: i32) -> (i32, i32, i32, i32) {
    %c0_i32 = arith.constant 0 : i32
    %c0_i32_0 = arith.constant 0 : i32
    %c0_i32_1 = arith.constant 0 : i32
    %c0_i32_2 = arith.constant 0 : i32
    return %arg0, %c0_i32, %c0_i32_0, %c0_i32_1 : i32, i32, i32, i32
  }
  func.func @transform_2(%arg0: i32) -> (i32, i32) {
    %c0_i32 = arith.constant 0 : i32
    %c0_i32_0 = arith.constant 0 : i32
    %c0_i32_1 = arith.constant 0 : i32
    return %c0_i32, %c0_i32_0 : i32, i32
  }
  func.func @transform_3(%arg0: i32) -> (i32, i32) {
    %c0_i32 = arith.constant 0 : i32
    %c0_i32_0 = arith.constant 0 : i32
    %c0_i32_1 = arith.constant 0 : i32
    return %c0_i32, %c0_i32_0 : i32, i32
  }
  func.func @transform_4(%arg0: i32) -> (i32, i32) {
    %c0_i32 = arith.constant 0 : i32
    %c0_i32_0 = arith.constant 0 : i32
    %c0_i32_1 = arith.constant 0 : i32
    return %c0_i32, %c0_i32_0 : i32, i32
  }
  func.func @transform_5(%arg0: i32) -> (i32, i32) {
    %c0_i32 = arith.constant 0 : i32
    %c0_i32_0 = arith.constant 0 : i32
    %c0_i32_1 = arith.constant 0 : i32
    return %c0_i32, %c0_i32_0 : i32, i32
  }
  func.func @transform_6(%arg0: i32) -> (i32, i32) {
    %c0_i32 = arith.constant 0 : i32
    %c0_i32_0 = arith.constant 0 : i32
    return %arg0, %c0_i32 : i32, i32
  }
}

</mosaic_0001>

<bundles_post_ra>
// kernel: tpu_custom_call.1
= control target key start
LH: loop header
LB: loop body
LE: loop exit
PB: predicated region body
PF: predicated region fallthrough
CT: control target
= control target key end

     0   :  { %11 = vsyncpa [#allocation3], 0  ;;  %s3053_s0 = inlined_call_operand.hbm [shape: f32[2,8,8,128], index: 0, kind: input, shape index: {}]   ;;  %s3054_s1 = inlined_call_operand.hbm [shape: f32[2,4,4,256], index: 1, kind: input, shape index: {}]   ;;  %s3055_s2 = inlined_call_operand.hbm [shape: bf16[1152,128], index: 2, kind: input, shape index: {}]   ;;  %s3056_s3 = inlined_call_operand.vmem [shape: f32[1,128], index: 3, kind: input, shape index: {}]   ;;  %s3057_s4 = inlined_call_operand.hbm [shape: bf16[1024,128], index: 4, kind: input, shape index: {}]   ;;  %s3058_s5 = inlined_call_operand.vmem [shape: f32[1,128], index: 5, kind: input, shape index: {}]   ;;  %s3059_s6 = inlined_call_operand.hbm [shape: f32[2,256], index: 6, kind: output, shape index: {}]  }
   0x1   :  { %12 = vsyncpa [#allocation6], 0 }
   0x2   :  { %13 = vsyncpa [#allocation9], 0 }
   0x3   :  { %14 = vsyncpa [#allocation4], 0  ;;  %s2726_s21 = smov [#allocation5]   ;;  %s2727_s23 = smov [#allocation2]  }
   0x4   :  { %s32_s22 = sshll.u32 %s2726_s21, 4  ;;  %s20_s24 = sshll.u32 %s2727_s23, 4  ;;  %s33_s22 = int_to_ptr.vmem [resolvable:$true] %s32_s22  ;;  %s2772_s24 = int_to_ptr.vmem [resolvable:$true] %s20_s24 }
   0x5   :  { %s2608_s27 = scalar_lea.hbm %s3054_s1, 1024 }
   0x6   :  { %p2609_p0 = scmp.ne.s32.totalorder %s3054_s1, %s2608_s27  ;;  %p2612_p1 = scmp.lt.u32.totalorder %s2608_s27, %s3054_s1 }
   0x8   :  { %p2614_p2 = pnand %p2612_p1, %p2609_p0 }
   0xa   :  { %2617 = shalt.err (!%p2614_p2)
}
   0xb   :  { %s2618_s8 = scalar_lea.vmem %s33_s22, 1024  ;;  %p2623_p4 = scmp.lt.s32.totalorder %s33_s22, %s33_s22 }
   0xc   :  { %p2619_p3 = scmp.ne.s32.totalorder %s33_s22, %s2618_s8  ;;  %p2624_p5 = scmp.lt.s32.totalorder %s2618_s8, %s2618_s8 }
   0xe   :  { %p2625_p6 = por %p2624_p5, %p2623_p4 }
  0x10   :  { %p2626_p7 = pnand %p2625_p6, %p2619_p3 }
  0x12   :  { %2629 = shalt.err (!%p2626_p7)
}
  0x13   :  { %s2728_s9 = smov 128   ;;  %s2729_s10 = smov 8  }
  0x14   :  { %38 = dma.hbm_to_vmem [thread:$0]  %s3054_s1, 1024, %s33_s22, [#allocation6], %s2728_s9, %s2728_s9, %s2729_s10  }
  0x15   :  { %s2630_s15 = scalar_lea.hbm %s3053_s0, 2048 }
  0x16   :  { %p2631_p8 = scmp.ne.s32.totalorder %s3053_s0, %s2630_s15  ;;  %p2634_p9 = scmp.lt.u32.totalorder %s2630_s15, %s3053_s0 }
  0x18   :  { %p2636_p10 = pnand %p2634_p9, %p2631_p8 }
  0x1a   :  { %2639 = shalt.err (!%p2636_p10)
}
  0x1b   :  { %s2640_s20 = scalar_lea.vmem %s2772_s24, 2048  ;;  %p2645_p12 = scmp.lt.s32.totalorder %s2772_s24, %s2772_s24 }
  0x1c   :  { %p2641_p11 = scmp.ne.s32.totalorder %s2772_s24, %s2640_s20  ;;  %p2646_p13 = scmp.lt.s32.totalorder %s2640_s20, %s2640_s20 }
  0x1e   :  { %p2647_p0 = por %p2646_p13, %p2645_p12 }
  0x20   :  { %p2648_p1 = pnand %p2647_p0, %p2641_p11 }
  0x22   :  { %2651 = shalt.err (!%p2648_p1)
}
  0x23   :  { %26 = dma.hbm_to_vmem [thread:$0]  %s3053_s0, 2048, %s2772_s24, [#allocation3], %s2728_s9, %s2728_s9, %s2729_s10  }
  0x24   :  { %s2730_s22 = smov [#allocation7]   ;;  %s2652_s27 = scalar_lea.hbm %s3055_s2, 9216 }
  0x25   :  { %s44_s23 = sshll.u32 %s2730_s22, 4  ;;  %p2653_p2 = scmp.ne.s32.totalorder %s3055_s2, %s2652_s27  ;;  %s45_s23 = int_to_ptr.vmem [resolvable:$true] %s44_s23 }
  0x26   :  { %p2656_p3 = scmp.lt.u32.totalorder %s2652_s27, %s3055_s2 }
  0x28   :  { %p2658_p4 = pnand %p2656_p3, %p2653_p2 }
  0x2a   :  { %2661 = shalt.err (!%p2658_p4)
}
  0x2b   :  { %s2662_s8 = scalar_lea.vmem %s45_s23, 9216  ;;  %p2667_p6 = scmp.lt.s32.totalorder %s45_s23, %s45_s23 }
  0x2c   :  { %p2663_p5 = scmp.ne.s32.totalorder %s45_s23, %s2662_s8  ;;  %p2668_p7 = scmp.lt.s32.totalorder %s2662_s8, %s2662_s8 }
  0x2e   :  { %p2669_p8 = por %p2668_p7, %p2667_p6 }
  0x30   :  { %p2670_p9 = pnand %p2669_p8, %p2663_p5 }
  0x32   :  { %2673 = shalt.err (!%p2670_p9)
}
  0x33   :  { %s2731_s0 = smov 64   ;;  %s2732_s24 = smov 4  }
  0x34   :  { %50 = dma.hbm_to_vmem [thread:$0]  %s3055_s2, 9216, %s45_s23, [#allocation6], %s2731_s0, %s2731_s0, %s2732_s24  }
  0x35   :  { %s2733_s11 = smov [#allocation8]   ;;  %s2674_s15 = scalar_lea.hbm %s3057_s4, 8192 }
  0x36   :  { %s58_s12 = sshll.u32 %s2733_s11, 4  ;;  %p2675_p10 = scmp.ne.s32.totalorder %s3057_s4, %s2674_s15  ;;  %s59_s12 = int_to_ptr.vmem [resolvable:$true] %s58_s12 }
  0x37   :  { %p2678_p11 = scmp.lt.u32.totalorder %s2674_s15, %s3057_s4 }
  0x39   :  { %p2680_p12 = pnand %p2678_p11, %p2675_p10 }
  0x3b   :  { %2683 = shalt.err (!%p2680_p12)
}
  0x3c   :  { %s2684_s20 = scalar_lea.vmem %s59_s12, 8192  ;;  %p2689_p0 = scmp.lt.s32.totalorder %s59_s12, %s59_s12 }
  0x3d   :  { %p2685_p13 = scmp.ne.s32.totalorder %s59_s12, %s2684_s20  ;;  %p2690_p1 = scmp.lt.s32.totalorder %s2684_s20, %s2684_s20 }
  0x3f   :  { %p2691_p2 = por %p2690_p1, %p2689_p0 }
  0x41   :  { %p2692_p3 = pnand %p2691_p2, %p2685_p13 }
  0x43   :  { %2695 = shalt.err (!%p2692_p3)
}
  0x44   :  { %64 = dma.hbm_to_vmem [thread:$0]  %s3057_s4, 8192, %s59_s12, [#allocation9], %s2731_s0, %s2731_s0, %s2732_s24  }
  0x45   :  { %2718 = dma.done.wait [#allocation3], 2048  }
  0x46   :  { %2719 = vsyncadd [#allocation3], 4294965248 }
  0x47   :  { %2720 = dma.done.wait [#allocation6], 10240  }
  0x48   :  { %2721 = vsyncadd [#allocation6], 4294957056 }
  0x49   :  { %2722 = dma.done.wait [#allocation9], 8192  }
  0x4a   :  { %2723 = vsyncadd [#allocation9], 4294959104  ;;  %v2464_v0 = vld [vmem:[#allocation7 + $0x40] sm:$0xff]   ;;  %v2468_v4 = vld [vmem:[#allocation7 + $0x48] sm:$0xff]   ;;  %vm102_vm0 = vcmask 1045504   ;;  %vm307_vm1 = vcmask 1041409  }
  0x4b   :  { %v2465_v1 = vld [vmem:[#allocation7] sm:$0xff]   ;;  %2248 = vmatprep.subr.bf16.mxu0 %v2464_v0  ;;  %v2469_v5 = vld [vmem:[#allocation7 + $0x8] sm:$0xff]   ;;  %v2472_v8 = vld [vmem:[#allocation7 + $0x50] sm:$0xff]   ;;  %vm2735_vm2 = vmmov 0   ;;  %vm1158_vm3 = vcmask 1043456   ;;  %vm1179_vm4 = vcmask 1042432  }
  0x4c   :  { %v2466_v2 = vld [vmem:[#allocation7 + $0xc0] sm:$0xff]   ;;  %2249 = vmatpush3.bf16.msra.mxu0 %v2465_v1  ;;  %v2470_v6 = vld [vmem:[#allocation7 + $0xc8] sm:$0xff]   ;;  %v2473_v9 = vld [vmem:[#allocation7 + $0x10] sm:$0xff]   ;;  %s2736_s23 = smov [#allocation10]  }
  0x4d   :  { %v2467_v3 = vld [vmem:[#allocation7 + $0x80] sm:$0xff]   ;;  %2270 = vmatprep.subr.bf16.mxu1 %v2466_v2  ;;  %2250 = vmatprep.subr.bf16.mxu0 %v2468_v4  ;;  %v2471_v7 = vld [vmem:[#allocation7 + $0x88] sm:$0xff]   ;;  %v2474_v10 = vld [vmem:[#allocation7 + $0xd0] sm:$0xff]  }
  0x4e   :  { %2271 = vmatpush3.bf16.msra.mxu1 %v2467_v3  ;;  %v2475_v11 = vld [vmem:[#allocation7 + $0x90] sm:$0xff]   ;;  %v2476_v12 = vld [vmem:[#allocation7 + $0x58] sm:$0xff]   ;;  %v2480_v16 = vld [vmem:[#allocation7 + $0x60] sm:$0xff]  }
  0x4f   :  { %2272 = vmatprep.subr.bf16.mxu1 %v2470_v6  ;;  %v2477_v13 = vld [vmem:[#allocation7 + $0x18] sm:$0xff]   ;;  %v2481_v17 = vld [vmem:[#allocation7 + $0x20] sm:$0xff]   ;;  %v2484_v20 = vld [vmem:[#allocation7 + $0x68] sm:$0xff]  }
  0x50   :  { %2251 = vmatpush3.bf16.msra.mxu0 %v2469_v5  ;;  %v2478_v14 = vld [vmem:[#allocation7 + $0xd8] sm:$0xff]   ;;  %v2482_v18 = vld [vmem:[#allocation7 + $0xe0] sm:$0xff]   ;;  %v2485_v21 = vld [vmem:[#allocation7 + $0x28] sm:$0xff]  }
  0x51   :  { %2252 = vmatprep.subr.bf16.mxu0 %v2472_v8  ;;  %v2479_v15 = vld [vmem:[#allocation7 + $0x98] sm:$0xff]   ;;  %v2483_v19 = vld [vmem:[#allocation7 + $0xa0] sm:$0xff]   ;;  %v2486_v22 = vld [vmem:[#allocation7 + $0xe8] sm:$0xff]  }
  0x52   :  { %2273 = vmatpush3.bf16.msra.mxu1 %v2471_v7  ;;  %v2487_v23 = vld [vmem:[#allocation7 + $0xa8] sm:$0xff]   ;;  %v2488_v24 = vld [vmem:[#allocation7 + $0x70] sm:$0xff]   ;;  %v2492_v28 = vld [vmem:[#allocation7 + $0x78] sm:$0xff]  }
  0x53   :  { %2274 = vmatprep.subr.bf16.mxu1 %v2474_v10  ;;  %v2489_v25 = vld [vmem:[#allocation7 + $0x30] sm:$0xff]   ;;  %v2493_v29 = vld [vmem:[#allocation7 + $0x38] sm:$0xff]   ;;  %v80_v31 = vld [vmem:[#allocation2] sm:$0xff] }
  0x54   :  { %2253 = vmatpush3.bf16.msra.mxu0 %v2473_v9  ;;  %v2490_v26 = vld [vmem:[#allocation7 + $0xf0] sm:$0xff]   ;;  %v2494_v30 = vld [vmem:[#allocation7 + $0xf8] sm:$0xff]   ;;  %v81_v32 = vld [vmem:[#allocation2 + $0x8] sm:$0xff] }
  0x55   :  { %2254 = vmatprep.subr.bf16.mxu0 %v2476_v12  ;;  %v2491_v27 = vld [vmem:[#allocation7 + $0xb0] sm:$0xff]   ;;  %v2829_v34 = vld [vmem:[#allocation2 + $0x18] sm:$0xff]  ;;  %v92_v35 = vadd.f32 %v81_v32, %v80_v31  ;;  %v86_v37 = vld [vmem:[#allocation2 + $0x40] sm:$0xff] }
  0x56   :  { %2275 = vmatpush3.bf16.msra.mxu1 %v2475_v11  ;;  %v2827_v33 = vld [vmem:[#allocation2 + $0x10] sm:$0xff]  ;;  %v87_v38 = vld [vmem:[#allocation2 + $0x48] sm:$0xff]  ;;  %v2834_v40 = vld [vmem:[#allocation2 + $0x20] sm:$0xff] }
  0x57   :  { %2276 = vmatprep.subr.bf16.mxu1 %v2478_v14  ;;  %v168_v36 = vadd.f32 %v2827_v33, %v81_v32  ;;  %v2832_v39 = vld [vmem:[#allocation2 + $0x50] sm:$0xff]  ;;  %v2836_v41 = vld [vmem:[#allocation2 + $0x58] sm:$0xff]  ;;  %v93_v42 = vadd.f32 %v92_v35, %v2827_v33  ;;  %v97_v43 = vadd.f32 %v87_v38, %v86_v37  ;;  %v2841_v46 = vld [vmem:[#allocation2 + $0x28] sm:$0xff] }
  0x58   :  { %2255 = vmatpush3.bf16.msra.mxu0 %v2477_v13  ;;  %v173_v45 = vadd.f32 %v2832_v39, %v87_v38  ;;  %v2843_v47 = vld [vmem:[#allocation2 + $0x60] sm:$0xff]  ;;  %v2495_v48 = vld [vmem:[#allocation7 + $0xb8] sm:$0xff]   ;;  %v2849_v54 = vld [vmem:[#allocation2 + $0x68] sm:$0xff] }
  0x59   :  { %2256 = vmatprep.subr.bf16.mxu0 %v2480_v16  ;;  %v169_v44 = vadd.f32 %v168_v36, %v2829_v34  ;;  %v94_v49 = vadd.f32 %v93_v42, %v2829_v34  ;;  %v98_v50 = vadd.f32 %v97_v43, %v2832_v39  ;;  %v2496_v51 = vld [vmem:[#allocation7 + $0x140] sm:$0xff]   ;;  %v2851_v55 = vld [vmem:[#allocation2 + $0x30] sm:$0xff] }
  0x5a   :  { %2277 = vmatpush3.bf16.msra.mxu1 %v2479_v15  ;;  %v174_v53 = vadd.f32 %v173_v45, %v2836_v41  ;;  %v2855_v58 = vld [vmem:[#allocation2 + $0x70] sm:$0xff]  ;;  %v2498_v61 = vld [vmem:[#allocation7 + $0x1c0] sm:$0xff]  }
  0x5b   :  { %2278 = vmatprep.subr.bf16.mxu1 %v2482_v18  ;;  %v170_v52 = vadd.f32 %v169_v44, %v2834_v40  ;;  %v95_v56 = vadd.f32 %v94_v49, %v2834_v40  ;;  %v99_v57 = vadd.f32 %v98_v50, %v2836_v41 }
  0x5c   :  { %2257 = vmatpush3.bf16.msra.mxu0 %v2481_v17  ;;  %v175_v60 = vadd.f32 %v174_v53, %v2843_v47 }
  0x5d   :  { %2258 = vmatprep.subr.bf16.mxu0 %v2484_v20  ;;  %v171_v59 = vadd.f32 %v170_v52, %v2841_v46  ;;  %v96_v62 = vadd.f32 %v95_v56, %v2841_v46  ;;  %v100_v63 = vadd.f32 %v99_v57, %v2843_v47 }
  0x5e   :  { %2279 = vmatpush3.bf16.msra.mxu1 %v2483_v19  ;;  %v176_v1 = vadd.f32 %v175_v60, %v2849_v54 }
  0x5f   :  { %2280 = vmatprep.subr.bf16.mxu1 %v2486_v22  ;;  %v2862_v0 = vadd.f32 %v171_v59, %v2851_v55  ;;  %v101_v2 = vadd.f32 %v100_v63, %v2849_v54  ;;  %v119_v3 = vrot.slane %v96_v62, 1  ;;  %v103_v4 = vsel %vm102_vm0, %v96_v62, 0.0 }
  0x60   :  { %2259 = vmatpush3.bf16.msra.mxu0 %v2485_v21  ;;  %v2868_v5 = vadd.f32 %v176_v1, %v2855_v58  ;;  %v104_v6 = vrot.slane %v103_v4, 4  ;;  %v137_v8 = vrot.slane %v96_v62, 2 }
  0x61   :  { %2260 = vmatprep.subr.bf16.mxu0 %v2488_v24  ;;  %v178_v7 = vsel %vm102_vm0, %v2862_v0, 0.0  ;;  %v120_v9 = vrot.slane %v101_v2, 1  ;;  %v123_v10 = vsel %vm102_vm0, %v119_v3, 0.0  ;;  %v110_v11 = vsel %vm102_vm0, %v101_v2, 0.0 }
  0x62   :  { %2281 = vmatpush3.bf16.msra.mxu1 %v2487_v23  ;;  %v179_v12 = vrot.slane %v178_v7, 4  ;;  %v124_v13 = vrot.slane %v123_v10, 4  ;;  %v105_v14 = vadd.f32 %v104_v6, %v103_v4  ;;  %v111_v15 = vrot.slane %v110_v11, 4 }
  0x63   :  { %2282 = vmatprep.subr.bf16.mxu1 %v2490_v26  ;;  %v185_v16 = vsel %vm102_vm0, %v2868_v5, 0.0  ;;  %v130_v17 = vsel %vm102_vm0, %v120_v9, 0.0  ;;  %v138_v26 = vrot.slane %v101_v2, 2 }
  0x64   :  { %2261 = vmatpush3.bf16.msra.mxu0 %v2489_v25  ;;  %v180_v18 = vadd.f32 %v179_v12, %v178_v7  ;;  %v186_v19 = vrot.slane %v185_v16, 4  ;;  %v125_v20 = vadd.f32 %v124_v13, %v123_v10  ;;  %v131_v21 = vrot.slane %v130_v17, 4 }
  0x65   :  { %2262 = vmatprep.subr.bf16.mxu0 %v2492_v28  ;;  %v106_v22 = vrot.slane %v105_v14, 2  ;;  %v112_v23 = vadd.f32 %v111_v15, %v110_v11  ;;  %v148_v37 = vsel %vm102_vm0, %v138_v26, 0.0  ;;  %v248_v12 = vadd.f32 %v2836_v41, %v2832_v39  ;;  %v2499_v41 = vld [vmem:[#allocation7 + $0x180] sm:$0xff]  }
  0x66   :  { %2283 = vmatpush3.bf16.msra.mxu1 %v2491_v27  ;;  %v181_v24 = vrot.slane %v180_v18, 2  ;;  %v187_v25 = vadd.f32 %v186_v19, %v185_v16  ;;  %v141_v27 = vsel %vm102_vm0, %v137_v8, 0.0  ;;  %v126_v28 = vrot.slane %v125_v20, 2 }
  0x67   :  { %2284 = vmatprep.subr.bf16.mxu1 %v2494_v30  ;;  %v107_v30 = vadd.f32 %v106_v22, %v105_v14  ;;  %v113_v31 = vrot.slane %v112_v23, 2  ;;  %v142_v36 = vrot.slane %v141_v27, 4  ;;  %v149_v50 = vrot.slane %v148_v37, 4 }
  0x68   :  { %2263 = vmatpush3.bf16.msra.mxu0 %v2493_v29  ;;  %v132_v29 = vadd.f32 %v131_v21, %v130_v17  ;;  %v182_v32 = vadd.f32 %v181_v24, %v180_v18  ;;  %v188_v35 = vrot.slane %v187_v25, 2  ;;  %v127_v38 = vadd.f32 %v126_v28, %v125_v20  ;;  %v2497_v18 = vld [vmem:[#allocation7 + $0x100] sm:$0xff]   ;;  %v2500_v21 = vld [vmem:[#allocation7 + $0x148] sm:$0xff]  }
  0x69   :  { %2292 = vmatprep.subr.bf16.mxu0 %v2496_v51  ;;  %v108_v43 = vrot.slane %v107_v30, 1  ;;  %v114_v44 = vadd.f32 %v113_v31, %v112_v23  ;;  %v143_v49 = vadd.f32 %v142_v36, %v141_v27  ;;  %v243_v8 = vadd.f32 %v2829_v34, %v2827_v33  ;;  %v2502_v28 = vld [vmem:[#allocation7 + $0x1c8] sm:$0xff]  }
  0x6a   :  { %2285 = vmatpush3.bf16.msra.mxu1 %v2495_v48  ;;  %v133_v42 = vrot.slane %v132_v29, 2  ;;  %v183_v45 = vrot.slane %v182_v32, 1  ;;  %v189_v48 = vadd.f32 %v188_v35, %v187_v25  ;;  %v128_v51 = vrot.slane %v127_v38, 1  ;;  %v2501_v25 = vld [vmem:[#allocation7 + $0x108] sm:$0xff]  }
  0x6b   :  { %2314 = vmatprep.subr.bf16.mxu1 %v2498_v61  ;;  %v109_v53 = vadd.f32 %v108_v43, %v107_v30  ;;  %v115_v56 = vrot.slane %v114_v44, 1  ;;  %v144_v60 = vrot.slane %v143_v49, 2  ;;  %v150_v61 = vadd.f32 %v149_v50, %v148_v37  ;;  %v2503_v36 = vld [vmem:[#allocation7 + $0x188] sm:$0xff]   ;;  %v2507_v50 = vld [vmem:[#allocation7 + $0x190] sm:$0xff]  }
  0x6c   :  { %v134_v52 = vadd.f32 %v133_v42, %v132_v29  ;;  %v184_v57 = vadd.f32 %v183_v45, %v182_v32  ;;  %v190_v59 = vrot.slane %v189_v48, 1  ;;  %v129_v62 = vadd.f32 %v128_v51, %v127_v38  ;;  %v2505_v38 = vld [vmem:[#allocation7 + $0x110] sm:$0xff]   ;;  %v2509_v51 = vld [vmem:[#allocation7 + $0x118] sm:$0xff]  }
  0x6d   :  { %v116_v1 = vadd.f32 %v115_v56, %v114_v44  ;;  %v145_v3 = vadd.f32 %v144_v60, %v143_v49  ;;  %v151_v4 = vrot.slane %v150_v61, 2  ;;  %v212_v16 = vrot.slane %v2862_v0, 2  ;;  %v2506_v44 = vld [vmem:[#allocation7 + $0x1d0] sm:$0xff]   ;;  %v2510_v56 = vld [vmem:[#allocation7 + $0x1d8] sm:$0xff]   ;;  %v2512_v60 = vld [vmem:[#allocation7 + $0x160] sm:$0xff]  }
  0x6e   :  { %v135_v63 = vrot.slane %v134_v52, 1  ;;  %v191_v2 = vadd.f32 %v190_v59, %v189_v48  ;;  %v213_v33 = vrot.slane %v2868_v5, 2  ;;  %v244_v34 = vadd.f32 %v243_v8, %v2834_v40  ;;  %v2504_v40 = vld [vmem:[#allocation7 + $0x150] sm:$0xff]   ;;  %v2508_v48 = vld [vmem:[#allocation7 + $0x158] sm:$0xff]   ;;  %v2514_v8 = vld [vmem:[#allocation7 + $0x1e0] sm:$0xff]  }
  0x6f   :  { %v308_v7 = vsel %vm307_vm1, %v116_v1, %v109_v53  ;;  %v146_v10 = vrot.slane %v145_v3, 1  ;;  %v152_v11 = vadd.f32 %v151_v4, %v150_v61  ;;  %v194_v22 = vrot.slane %v2862_v0, 1  ;;  %v2511_v4 = vld [vmem:[#allocation7 + $0x198] sm:$0xff]  }
  0x70   :  { %v136_v6 = vadd.f32 %v135_v63, %v134_v52  ;;  %v320_v9 = vsel %vm307_vm1, %v191_v2, %v184_v57  ;;  %v342_v14 = vpack.c.bf16 %v308_v7, %v308_v7  ;;  %v216_v23 = vsel %vm102_vm0, %v212_v16, 0.0  ;;  %v236_v63 = vld [vmem:[#allocation2 + $0x38] sm:$0xff] }
  0x71   :  { %v345_v15 = vpack.c.bf16 %v320_v9, %v320_v9  ;;  %v147_v19 = vadd.f32 %v146_v10, %v145_v3  ;;  %v153_v20 = vrot.slane %v152_v11, 1  ;;  %v249_v24 = vadd.f32 %v248_v12, %v2843_v47  ;;  %v242_v2 = vld [vmem:[#allocation2 + $0x78] sm:$0xff] }
  0x72   :  { %v312_v13 = vsel %vm307_vm1, %v136_v6, %v129_v62  ;;  %v217_v26 = vrot.slane %v216_v23, 4  ;;  %v223_v29 = vsel %vm102_vm0, %v213_v33, 0.0  ;;  %v245_v32 = vadd.f32 %v244_v34, %v2841_v46 }
  0x73   :  { %v343_v17 = vpack.c.bf16 %v312_v13, %v312_v13  ;;  %1006 = vmatprep.mubr.bf16.mxu1 %v345_v15  ;;  %v154_v39 = vadd.f32 %v153_v20, %v152_v11  ;;  %v224_v0 = vrot.slane %v223_v29, 4  ;;  %v195_v35 = vrot.slane %v2868_v5, 1  ;;  %v2516_v13 = vld [vmem:[#allocation7 + $0x168] sm:$0xff]   ;;  %v2515_v20 = vld [vmem:[#allocation7 + $0x1a0] sm:$0xff]  }
  0x74   :  { %v218_v31 = vadd.f32 %v217_v26, %v216_v23  ;;  %v198_v47 = vsel %vm102_vm0, %v194_v22, 0.0  ;;  %v250_v37 = vadd.f32 %v249_v24, %v2849_v54  ;;  %v246_v5 = vadd.f32 %v245_v32, %v2851_v55 }
  0x75   :  { %966 = vmatprep.mubr.bf16.mxu0 %v343_v17  ;;  %v316_v27 = vsel %vm307_vm1, %v154_v39, %v147_v19  ;;  %v225_v43 = vadd.f32 %v224_v0, %v223_v29  ;;  %v199_v45 = vrot.slane %v198_v47, 4  ;;  %v205_v54 = vsel %vm102_vm0, %v195_v35, 0.0  ;;  %v2518_v39 = vld [vmem:[#allocation7 + $0x1e8] sm:$0xff]   ;;  %v2520_v29 = vld [vmem:[#allocation7 + $0x170] sm:$0xff]  }
  0x76   :  { %967 = vmatmul.mubr.bf16.vlgmr.msra.gmra.mrb[0].mxu0 %v342_v14  ;;  %v344_v30 = vpack.c.bf16 %v316_v27, %v316_v27  ;;  %v219_v42 = vrot.slane %v218_v31, 2  ;;  %v251_v53 = vadd.f32 %v250_v37, %v2855_v58  ;;  %v206_v62 = vrot.slane %v205_v54, 4  ;;  %v2513_v58 = vld [vmem:[#allocation7 + $0x120] sm:$0xff]   ;;  %v2521_v35 = vld [vmem:[#allocation7 + $0x130] sm:$0xff]  }
  0x77   :  { %2293 = vmatpush3.bf16.msra.mxu0 %v2497_v18  ;;  %v226_v46 = vrot.slane %v225_v43, 2  ;;  %v200_v52 = vadd.f32 %v199_v45, %v198_v47  ;;  %v2901_v3 = vadd.f32 %v246_v5, %v236_v63  ;;  %v2522_v37 = vld [vmem:[#allocation7 + $0x1f0] sm:$0xff]   ;;  %v2524_v45 = vld [vmem:[#allocation7 + $0x178] sm:$0xff]  }
  0x78   :  { %2294 = vmatprep.subr.bf16.mxu0 %v2500_v21  ;;  %1007 = vmatmul.mubr.bf16.vlgmr.msra.gmra.mrb[0].mxu1 %v344_v30  ;;  %v220_v49 = vadd.f32 %v219_v42, %v218_v31  ;;  %v207_v6 = vadd.f32 %v206_v62, %v205_v54  ;;  %v2903_v7 = vadd.f32 %v251_v53, %v242_v2  ;;  %v2517_v21 = vld [vmem:[#allocation7 + $0x128] sm:$0xff]  }
  0x79   :  { %2315 = vmatpush3.bf16.msra.mxu1 %v2499_v41  ;;  %v227_v59 = vadd.f32 %v226_v46, %v225_v43  ;;  %v201_v61 = vrot.slane %v200_v52, 2  ;;  %v269_v11 = vrot.slane %v2901_v3, 1  ;;  %v253_v12 = vsel %vm102_vm0, %v2901_v3, 0.0  ;;  %v2519_v31 = vld [vmem:[#allocation7 + $0x1a8] sm:$0xff]  }
  0x7a   :  { %2316 = vmatprep.subr.bf16.mxu1 %v2502_v28  ;;  %v221_v57 = vrot.slane %v220_v49, 1  ;;  %v208_v14 = vrot.slane %v207_v6, 2  ;;  %v270_v15 = vrot.slane %v2903_v7, 1  ;;  %v254_v16 = vrot.slane %v253_v12, 4 }
  0x7b   :  { %2295 = vmatpush3.bf16.msra.mxu0 %v2501_v25  ;;  %v228_v55 = vrot.slane %v227_v59, 1  ;;  %v202_v10 = vadd.f32 %v201_v61, %v200_v52  ;;  %v273_v18 = vsel %vm102_vm0, %v269_v11, 0.0  ;;  %v260_v19 = vsel %vm102_vm0, %v2903_v7, 0.0  ;;  %v2525_v52 = vld [vmem:[#allocation7 + $0x138] sm:$0xff]  }
  0x7c   :  { %2296 = vmatprep.subr.bf16.mxu0 %v2504_v40  ;;  %v222_v1 = vadd.f32 %v221_v57, %v220_v49  ;;  %v209_v34 = vadd.f32 %v208_v14, %v207_v6  ;;  %v274_v22 = vrot.slane %v273_v18, 4  ;;  %v280_v23 = vsel %vm102_vm0, %v270_v15, 0.0  ;;  %v2528_v6 = vld [vmem:[#allocation7 + $0x200] sm:$0xff]   ;;  %v2531_v14 = vld [vmem:[#allocation7 + $0x208] sm:$0xff]  }
  0x7d   :  { %2317 = vmatpush3.bf16.msra.mxu1 %v2503_v36  ;;  %v229_v9 = vadd.f32 %v228_v55, %v227_v59  ;;  %v203_v41 = vrot.slane %v202_v10, 1  ;;  %v255_v24 = vadd.f32 %v254_v16, %v253_v12  ;;  %v261_v25 = vrot.slane %v260_v19, 4  ;;  %v2526_v59 = vld [vmem:[#allocation7 + $0x1f8] sm:$0xff]   ;;  %v2532_v16 = vld [vmem:[#allocation8 + $0x48] sm:$0xff]  }
  0x7e   :  { %2318 = vmatprep.subr.bf16.mxu1 %v2506_v44  ;;  %v210_v26 = vrot.slane %v209_v34, 1  ;;  %v275_v27 = vadd.f32 %v274_v22, %v273_v18  ;;  %v281_v28 = vrot.slane %v280_v23, 4  ;;  %v287_v61 = vrot.slane %v2901_v3, 2  ;;  %v1136_v22 = vld [vmem:[#allocation5 + $0x10] sm:$0xff] }
  0x7f   :  { %2297 = vmatpush3.bf16.msra.mxu0 %v2505_v38  ;;  %v328_v17 = vsel %vm307_vm1, %v229_v9, %v222_v1  ;;  %v256_v30 = vrot.slane %v255_v24, 2  ;;  %v262_v40 = vadd.f32 %v261_v25, %v260_v19  ;;  %v204_v38 = vadd.f32 %v203_v41, %v202_v10  ;;  %v2527_v1 = vld [vmem:[#allocation7 + $0x1b8] sm:$0xff]   ;;  %v2529_v10 = vld [vmem:[#allocation8 + $0x40] sm:$0xff]   ;;  %v2534_v19 = vld [vmem:[#allocation7 + $0x210] sm:$0xff]  }
  0x80   :  { %2298 = vmatprep.subr.bf16.mxu0 %v2508_v48  ;;  %v347_v33 = vpack.c.bf16 %v328_v17, %v328_v17  ;;  %v276_v0 = vrot.slane %v275_v27, 2  ;;  %v282_v32 = vadd.f32 %v281_v28, %v280_v23  ;;  %v211_v42 = vadd.f32 %v210_v26, %v209_v34  ;;  %v2533_v17 = vld [vmem:[#allocation8 + $0x8] sm:$0xff]   ;;  %v1139_v25 = vld [vmem:[#allocation5 + $0x30] sm:$0xff] }
  0x81   :  { %2319 = vmatpush3.bf16.msra.mxu1 %v2507_v50  ;;  %v257_v36 = vadd.f32 %v256_v30, %v255_v24  ;;  %v263_v47 = vrot.slane %v262_v40, 2  ;;  %v2523_v50 = vld [vmem:[#allocation7 + $0x1b0] sm:$0xff]   ;;  %v288_v63 = vrot.slane %v2903_v7, 2  ;;  %v291_v2 = vsel %vm102_vm0, %v287_v61, 0.0  ;;  %v1135_v34 = vld [vmem:[#allocation5 + $0x8] sm:$0xff] }
  0x82   :  { %2320 = vmatprep.subr.bf16.mxu1 %v2510_v56  ;;  %1046 = vmatprep.mubr.bf16.mxu0 %v347_v33  ;;  %v277_v43 = vadd.f32 %v276_v0, %v275_v27  ;;  %v283_v44 = vrot.slane %v282_v32, 2  ;;  %v324_v54 = vsel %vm307_vm1, %v211_v42, %v204_v38  ;;  %v2734_v9 = vmov 0.0   ;;  %v1134_v33 = vld [vmem:[#allocation5] sm:$0xff]  ;;  %v1138_v24 = vld [vmem:[#allocation5 + $0x28] sm:$0xff]  ;;  %v2538_v38 = vld [vmem:[#allocation8 + $0x58] sm:$0xff]  }
  0x83   :  { %2299 = vmatpush3.bf16.msra.mxu0 %v2509_v51  ;;  %v258_v48 = vrot.slane %v257_v36, 1  ;;  %v264_v49 = vadd.f32 %v263_v47, %v262_v40  ;;  %v346_v55 = vpack.c.bf16 %v324_v54, %v324_v54  ;;  %v298_v7 = vsel %vm102_vm0, %v288_v63, 0.0 }
  0x84   :  { %2300 = vmatprep.subr.bf16.mxu0 %v2512_v60  ;;  %v278_v46 = vrot.slane %v277_v43, 1  ;;  %v284_v5 = vadd.f32 %v283_v44, %v282_v32  ;;  %v299_v11 = vrot.slane %v298_v7, 4  ;;  %v1146_v41 = vcombine.high %v1134_v33, %v1134_v33  ;;  %v2537_v32 = vld [vmem:[#allocation7 + $0x218] sm:$0xff]  }
  0x85   :  { %2321 = vmatpush3.bf16.msra.mxu1 %v2511_v4  ;;  %v265_v51 = vrot.slane %v264_v49, 1  ;;  %v259_v57 = vadd.f32 %v258_v48, %v257_v36  ;;  %v1147_v26 = vcombine.high %v1135_v34, %v1135_v34  ;;  %v1148_v27 = vcombine.high %v1136_v22, %v1136_v22  ;;  %v2539_v48 = vld [vmem:[#allocation8 + $0x18] sm:$0xff]  }
  0x86   :  { %2322 = vmatprep.subr.bf16.mxu1 %v2514_v8  ;;  %v279_v53 = vadd.f32 %v278_v46, %v277_v43  ;;  %v285_v56 = vrot.slane %v284_v5, 1  ;;  %v292_v8 = vrot.slane %v291_v2, 4  ;;  %v300_v18 = vadd.f32 %v299_v11, %v298_v7 }
  0x87   :  { %2301 = vmatpush3.bf16.msra.mxu0 %v2513_v58  ;;  %v266_v60 = vadd.f32 %v265_v51, %v264_v49  ;;  %v1159_v28 = vsel %vm1158_vm3, %v1134_v33, 0.0  ;;  %v1150_v40 = vcombine.high %v1138_v24, %v1138_v24  ;;  %v1164_v0 = vsel %vm1158_vm3, %v1146_v41, 0.0  ;;  %v2540_v49 = vld [vmem:[#allocation7 + $0x220] sm:$0xff]  }
  0x88   :  { %2302 = vmatprep.subr.bf16.mxu0 %v2516_v13  ;;  %v286_v62 = vadd.f32 %v285_v56, %v284_v5  ;;  %v2530_v13 = vld [vmem:[#allocation8] sm:$0xff]   ;;  %v293_v15 = vadd.f32 %v292_v8, %v291_v2  ;;  %v301_v23 = vrot.slane %v300_v18, 2  ;;  %v2928_v36 = vsel %vm1158_vm3, %v1147_v26, 0.0 }
  0x89   :  { %2323 = vmatpush3.bf16.msra.mxu1 %v2515_v20  ;;  %v332_v58 = vsel %vm307_vm1, %v266_v60, %v259_v57  ;;  %v2535_v20 = vld [vmem:[#allocation8 + $0x50] sm:$0xff]   ;;  %v2931_v47 = vsel %vm1158_vm3, %v1148_v27, 0.0  ;;  %v1166_v42 = vadd.f32 %v2928_v36, %v1164_v0  ;;  %v2940_v44 = vsel %vm1158_vm3, %v1150_v40, 0.0  ;;  %v2541_v56 = vld [vmem:[#allocation8 + $0x60] sm:$0xff]   ;;  %v2549_v27 = vld [vmem:[#allocation7 + $0x238] sm:$0xff]  }
  0x8a   :  { %2324 = vmatprep.subr.bf16.mxu1 %v2518_v39  ;;  %v336_v4 = vsel %vm307_vm1, %v286_v62, %v279_v53  ;;  %v348_v12 = vpack.c.bf16 %v332_v58, %v332_v58  ;;  %v1137_v39 = vld [vmem:[#allocation5 + $0x20] sm:$0xff]  ;;  %v302_v51 = vadd.f32 %v301_v23, %v300_v18  ;;  %v2955_v53 = vsel %vm1158_vm3, %v1138_v24, 0.0  ;;  %v2546_v18 = vld [vmem:[#allocation7 + $0x230] sm:$0xff]  }
  0x8b   :  { %2303 = vmatpush3.bf16.msra.mxu0 %v2517_v21  ;;  %v349_v3 = vpack.c.bf16 %v336_v4, %v336_v4  ;;  %v294_v21 = vrot.slane %v293_v15, 2  ;;  %v1149_v30 = vcombine.high %v1137_v39, %v1137_v39  ;;  %v1169_v54 = vsel %vm1158_vm3, %v1137_v39, 0.0  ;;  %v2547_v39 = vld [vmem:[#allocation8 + $0x70] sm:$0xff]  }
  0x8c   :  { %2304 = vmatprep.subr.bf16.mxu0 %v2520_v29  ;;  %v2536_v29 = vld [vmem:[#allocation8 + $0x10] sm:$0xff]   ;;  %v1171_v60 = vadd.f32 %v2955_v53, %v1169_v54  ;;  %v2965_v61 = vsel %vm1158_vm3, %v1139_v25, 0.0 }
  0x8d   :  { %2325 = vmatpush3.bf16.msra.mxu1 %v2519_v31  ;;  %1086 = vmatprep.mubr.bf16.mxu1 %v349_v3  ;;  %v1151_v31 = vcombine.high %v1139_v25, %v1139_v25  ;;  %v1174_v43 = vsel %vm1158_vm3, %v1149_v30, 0.0  ;;  %v2548_v25 = vld [vmem:[#allocation8 + $0x30] sm:$0xff]  }
  0x8e   :  { %2326 = vmatprep.subr.bf16.mxu1 %v2522_v37  ;;  %v2934_v37 = vsel %vm1158_vm3, %v1135_v34, 0.0  ;;  %v1176_v46 = vadd.f32 %v2940_v44, %v1174_v43  ;;  %v2551_v43 = vld [vmem:[#allocation8 + $0x38] sm:$0xff]  }
  0x8f   :  { %2305 = vmatpush3.bf16.msra.mxu0 %v2521_v35  ;;  %v295_v35 = vadd.f32 %v294_v21, %v293_v15  ;;  %v1161_v5 = vadd.f32 %v2934_v37, %v1159_v28  ;;  %v2550_v28 = vld [vmem:[#allocation8 + $0x78] sm:$0xff]  }
  0x90   :  { %2306 = vmatprep.subr.bf16.mxu0 %v2524_v45  ;;  %v2943_v45 = vsel %vm1158_vm3, %v1151_v31, 0.0 }
  0x91   :  { %2327 = vmatpush3.bf16.msra.mxu1 %v2523_v50  ;;  %v2948_v50 = vsel %vm1158_vm3, %v1136_v22, 0.0  ;;  %v2958_v57 = vadd.f32 %v2943_v45, %v1176_v46  ;;  %v296_v62 = vrot.slane %v295_v35, 1  ;;  %v2553_v46 = vld [vmem:[#allocation8 + $0x80] sm:$0xff]  }
  0x92   :  { %2328 = vmatprep.subr.bf16.mxu1 %v2526_v59  ;;  %v2961_v59 = vadd.f32 %v2948_v50, %v1161_v5 }
  0x93   :  { %2307 = vmatpush3.bf16.msra.mxu0 %v2525_v52  ;;  %v2951_v52 = vadd.f32 %v2931_v47, %v1166_v42  ;;  %v1201_v4 = vsel %vm1179_vm4, %v2958_v57, 0.0  ;;  %v297_v33 = vadd.f32 %v296_v62, %v295_v35  ;;  %v1215_v54 = vrot.slane %v2958_v57, 1 }
  0x94   :  { %2433 = vmatprep.subr.bf16.mxu0 %v2734_v9  ;;  %v1180_v58 = vsel %vm1179_vm4, %v2961_v59, 0.0  ;;  %v1202_v8 = vrot.slane %v1201_v4, 4 }
  0x95   :  { %2329 = vmatpush3.bf16.msra.mxu1 %v2527_v1  ;;  %v1187_v63 = vsel %vm1179_vm4, %v2951_v52, 0.0  ;;  %v2542_v1 = vld [vmem:[#allocation8 + $0x20] sm:$0xff]   ;;  %v1181_v3 = vrot.slane %v1180_v58, 4 }
  0x96   :  { %1047 = vmatmul.mubr.bf16.vlgmr.msra.gmra.mrb[4].mxu0 %v346_v55  ;;  %2345 = vmatprep.subr.bf16.mxu1 %v2529_v10  ;;  %v2543_v55 = vld [vmem:[#allocation7 + $0x228] sm:$0xff]   ;;  %v1188_v2 = vrot.slane %v1187_v63, 4  ;;  %v303_v10 = vrot.slane %v302_v51, 1 }
  0x97   :  { %2434 = vmatpush3.bf16.msra.mxu0 %v2528_v6  ;;  %2449 = vmatprep.mubr.msk.bf16.mxu0 %vm2735_vm2, %v2734_v9  ;;  %v2973_v6 = vadd.f32 %v2965_v61, %v1171_v60  ;;  %v2560_v60 = vld [vmem:[#allocation8 + $0x140] sm:$0xff]  }
  0x98   :  { %2435 = vmatprep.subr.bf16.mxu0 %v2734_v9  ;;  %1087 = vmatmul.mubr.bf16.vlgmr.msra.gmra.mrb[4].mxu1 %v348_v12  ;;  %v1189_v7 = vadd.f32 %v1188_v2, %v1187_v63  ;;  %v2544_v12 = vld [vmem:[#allocation8 + $0x68] sm:$0xff]   ;;  %v304_v34 = vadd.f32 %v303_v10, %v302_v51  ;;  %v2566_v10 = vld [vmem:[#allocation8 + $0xd0] sm:$0xff]  }
  0x99   :  { %2346 = vmatpush3.bf16.msra.mxu1 %v2530_v13  ;;  %v1194_v11 = vsel %vm1179_vm4, %v2973_v6, 0.0  ;;  %v1203_v13 = vadd.f32 %v1202_v8, %v1201_v4  ;;  %v2562_v63 = vld [vmem:[#allocation8 + $0xc8] sm:$0xff]  }
  0x9a   :  { %2347 = vmatprep.subr.bf16.mxu1 %v2532_v16  ;;  %v1195_v15 = vrot.slane %v1194_v11, 4  ;;  %v1190_v16 = vrot.slane %v1189_v7, 2  ;;  %v340_v31 = vsel %vm307_vm1, %v304_v34, %v297_v33  ;;  %v2563_v4 = vld [vmem:[#allocation8 + $0x88] sm:$0xff]   ;;  %v2569_v33 = vld [vmem:[#allocation8 + $0x110] sm:$0xff]   ;;  %v2571_v34 = vld [vmem:[#allocation8 + $0x98] sm:$0xff]  }
  0x9b   :  { %2436 = vmatpush3.bf16.msra.mxu0 %v2531_v14  ;;  %v1182_v14 = vadd.f32 %v1181_v3, %v1180_v58  ;;  %v2564_v8 = vld [vmem:[#allocation8 + $0x148] sm:$0xff]   ;;  %v1212_v3 = vrot.slane %v2961_v59, 1  ;;  %v2570_v59 = vld [vmem:[#allocation8 + $0xd8] sm:$0xff]  }
  0x9c   :  { %2437 = vmatprep.subr.bf16.mxu0 %v2734_v9  ;;  %v1196_v21 = vadd.f32 %v1195_v15, %v1194_v11  ;;  %v1191_v22 = vadd.f32 %v1190_v16, %v1189_v7 }
  0x9d   :  { %2348 = vmatpush3.bf16.msra.mxu1 %v2533_v17  ;;  %v2545_v17 = vld [vmem:[#allocation8 + $0x28] sm:$0xff]  }
  0x9e   :  { %2349 = vmatprep.subr.bf16.mxu1 %v2535_v20  ;;  %v1183_v20 = vrot.slane %v1182_v14, 2  ;;  %v1197_v24 = vrot.slane %v1196_v21, 2  ;;  %v1192_v26 = vrot.slane %v1191_v22, 1 }
  0x9f   :  { %2438 = vmatpush3.bf16.msra.mxu0 %v2534_v19  ;;  %v1204_v19 = vrot.slane %v1203_v13, 2 }
  0xa0   :  { %2439 = vmatprep.subr.bf16.mxu0 %v2734_v9  ;;  %v1184_v23 = vadd.f32 %v1183_v20, %v1182_v14  ;;  %v1198_v40 = vadd.f32 %v1197_v24, %v1196_v21  ;;  %v1193_v0 = vadd.f32 %v1192_v26, %v1191_v22  ;;  %v2567_v14 = vld [vmem:[#allocation8 + $0x90] sm:$0xff]   ;;  %v1275_v21 = vadd.f32 %v2948_v50, %v2934_v37  ;;  %v1251_v26 = vld [vmem:[#allocation5 + $0x18] sm:$0xff] }
  0xa1   :  { %2350 = vmatpush3.bf16.msra.mxu1 %v2536_v29  ;;  %v1205_v41 = vadd.f32 %v1204_v19, %v1203_v13  ;;  %v1214_v13 = vrot.slane %v2973_v6, 1  ;;  %v2572_v37 = vld [vmem:[#allocation8 + $0x158] sm:$0xff]  }
  0xa2   :  { %2351 = vmatprep.subr.bf16.mxu1 %v2538_v38  ;;  %v1185_v30 = vrot.slane %v1184_v23, 1  ;;  %v1199_v42 = vrot.slane %v1198_v40, 1 }
  0xa3   :  { %2440 = vmatpush3.bf16.msra.mxu0 %v2537_v32  ;;  %v1206_v29 = vrot.slane %v1205_v41, 1  ;;  %v2552_v32 = vld [vmem:[#allocation8 + $0xc0] sm:$0xff]   ;;  %v1234_v22 = vsel %vm1179_vm4, %v1214_v13, 0.0 }
  0xa4   :  { %2441 = vmatprep.subr.bf16.mxu0 %v2734_v9  ;;  %v1186_v38 = vadd.f32 %v1185_v30, %v1184_v23  ;;  %v1200_v51 = vadd.f32 %v1199_v42, %v1198_v40  ;;  %v1276_v40 = vsel %vm1158_vm3, %v1251_v26, 0.0  ;;  %v2576_v42 = vld [vmem:[#allocation8 + $0x160] sm:$0xff]  }
  0xa5   :  { %2352 = vmatpush3.bf16.msra.mxu1 %v2539_v48  ;;  %v1207_v35 = vadd.f32 %v1206_v29, %v1205_v41  ;;  %v1213_v48 = vrot.slane %v2951_v52, 1  ;;  %v2561_v52 = vld [vmem:[#allocation8 + $0x100] sm:$0xff]   ;;  %v1285_v41 = vadd.f32 %v2965_v61, %v2955_v53  ;;  %v1263_v29 = vcombine.high %v1251_v26, %v1251_v26 }
  0xa6   :  { %2353 = vmatprep.subr.bf16.mxu1 %v2541_v56  ;;  %v1365_v62 = vsel %vm307_vm1, %v1200_v51, %v1186_v38  ;;  %v3002_v61 = vadd.f32 %v1276_v40, %v1275_v21 }
  0xa7   :  { %2442 = vmatpush3.bf16.msra.mxu0 %v2540_v49  ;;  %v350_v49 = vpack.c.bf16 %v340_v31, %v340_v31  ;;  %v1366_v5 = vsel %vm307_vm1, %v1207_v35, %v1193_v0  ;;  %v1393_v2 = vpack.c.bf16 %v1365_v62, %v1365_v62  ;;  %v2573_v0 = vld [vmem:[#allocation8 + $0x118] sm:$0xff]  }
  0xa8   :  { %2443 = vmatprep.subr.bf16.mxu0 %v2734_v9  ;;  %v1394_v56 = vpack.c.bf16 %v1366_v5, %v1366_v5 }
  0xa9   :  { %2354 = vmatpush3.bf16.msra.mxu1 %v2542_v1 }
  0xaa   :  { %2355 = vmatprep.subr.bf16.mxu1 %v2544_v12  ;;  %1952 = vmatprep.mubr.bf16.mxu1 %v1394_v56  ;;  %v2565_v12 = vld [vmem:[#allocation8 + $0x108] sm:$0xff]  }
  0xab   :  { %2444 = vmatpush3.bf16.msra.mxu0 %v2543_v55  ;;  %v1241_v55 = vsel %vm1179_vm4, %v1215_v54, 0.0  ;;  %v1293_v54 = vsel %vm1179_vm4, %v3002_v61, 0.0 }
  0xac   :  { %2445 = vmatprep.subr.bf16.mxu0 %v2734_v9  ;;  %v1242_v58 = vrot.slane %v1241_v55, 4 }
  0xad   :  { %2356 = vmatpush3.bf16.msra.mxu1 %v2545_v17  ;;  %v2568_v17 = vld [vmem:[#allocation8 + $0x150] sm:$0xff]  }
  0xae   :  { %2357 = vmatprep.subr.bf16.mxu1 %v2547_v39  ;;  %v1243_v11 = vadd.f32 %v1242_v58, %v1241_v55  ;;  %v1280_v39 = vadd.f32 %v2931_v47, %v2928_v36  ;;  %v2574_v36 = vld [vmem:[#allocation8 + $0xe0] sm:$0xff]   ;;  %v2579_v58 = vld [vmem:[#allocation8 + $0xa8] sm:$0xff]  }
  0xaf   :  { %2446 = vmatpush3.bf16.msra.mxu0 %v2546_v18  ;;  %v1220_v18 = vsel %vm1179_vm4, %v1212_v3, 0.0 }
  0xb0   :  { %2447 = vmatprep.subr.bf16.mxu0 %v2734_v9  ;;  %v1227_v9 = vsel %vm1179_vm4, %v1213_v48, 0.0  ;;  %v1244_v16 = vrot.slane %v1243_v11, 2  ;;  %v1221_v6 = vrot.slane %v1220_v18, 4 }
  0xb1   :  { %2358 = vmatpush3.bf16.msra.mxu1 %v2548_v25  ;;  %v1228_v1 = vrot.slane %v1227_v9, 4  ;;  %v1235_v25 = vrot.slane %v1234_v22, 4 }
  0xb2   :  { %2359 = vmatprep.subr.bf16.mxu1 %v2550_v28  ;;  %v1245_v20 = vadd.f32 %v1244_v16, %v1243_v11  ;;  %v1290_v28 = vadd.f32 %v2943_v45, %v2940_v44  ;;  %v1222_v50 = vadd.f32 %v1221_v6, %v1220_v18  ;;  %v1281_v45 = vsel %vm1158_vm3, %v1263_v29, 0.0  ;;  %v2583_v16 = vld [vmem:[#allocation8 + $0xb0] sm:$0xff]  }
  0xb3   :  { %2448 = vmatpush3.bf16.msra.mxu0 %v2549_v27  ;;  %v1229_v57 = vadd.f32 %v1228_v1, %v1227_v9  ;;  %v1254_v27 = vld [vmem:[#allocation5 + $0x38] sm:$0xff]  ;;  %v1236_v53 = vadd.f32 %v1235_v25, %v1234_v22  ;;  %v1294_v1 = vrot.slane %v1293_v54, 4 }
  0xb4   :  { %2367 = vmatprep.subr.bf16.mxu0 %v2552_v32  ;;  %v1246_v24 = vrot.slane %v1245_v20, 1  ;;  %v1266_v30 = vcombine.high %v1254_v27, %v1254_v27  ;;  %v1286_v31 = vsel %vm1158_vm3, %v1254_v27, 0.0  ;;  %v2575_v32 = vld [vmem:[#allocation8 + $0xa0] sm:$0xff]   ;;  %v1223_v44 = vrot.slane %v1222_v50, 2  ;;  %v2587_v27 = vld [vmem:[#allocation8 + $0xb8] sm:$0xff]  }
  0xb5   :  { %2360 = vmatpush3.bf16.msra.mxu1 %v2551_v43  ;;  %v1230_v7 = vrot.slane %v1229_v57, 2  ;;  %v3007_v38 = vadd.f32 %v1286_v31, %v1285_v41  ;;  %v1237_v48 = vrot.slane %v1236_v53, 2  ;;  %v1295_v3 = vadd.f32 %v1294_v1, %v1293_v54  ;;  %v2594_v54 = vld [vmem:[#allocation8 + $0x1c8] sm:$0xff]  }
  0xb6   :  { %2450 = vmatmul.mubr.bf16.vlgmr.msra.gmra.mrb[8].mxu0 %v350_v49  ;;  %2389 = vmatprep.subr.bf16.mxu1 %v2560_v60  ;;  %v1247_v47 = vadd.f32 %v1246_v24, %v1245_v20  ;;  %v1291_v35 = vsel %vm1158_vm3, %v1266_v30, 0.0  ;;  %v3010_v49 = vadd.f32 %v1281_v45, %v1280_v39  ;;  %v1224_v51 = vadd.f32 %v1223_v44, %v1222_v50  ;;  %v2578_v60 = vld [vmem:[#allocation8 + $0xe8] sm:$0xff]   ;;  %v2586_v39 = vld [vmem:[#allocation8 + $0xf8] sm:$0xff]   ;;  %v2585_v24 = vld [vmem:[#allocation8 + $0x130] sm:$0xff]  }
  0xb7   :  { %2368 = vmatpush3.bf16.msra.mxu0 %v2553_v46  ;;  %v1231_v15 = vadd.f32 %v1230_v7, %v1229_v57  ;;  %v3012_v46 = vadd.f32 %v1291_v35, %v1290_v28  ;;  %v1307_v56 = vsel %vm1179_vm4, %v3007_v38, 0.0  ;;  %v1238_v9 = vadd.f32 %v1237_v48, %v1236_v53  ;;  %v2590_v53 = vld [vmem:[#allocation8 + $0x1c0] sm:$0xff]   ;;  %v2595_v1 = vld [vmem:[#allocation8 + $0x188] sm:$0xff]  }
  0xb8   :  { %2369 = vmatprep.subr.bf16.mxu0 %v2562_v63  ;;  %1953 = vmatmul.mubr.bf16.vlgmr.msra.gmra.mrb[8].mxu1 %v1393_v2  ;;  %v1300_v62 = vsel %vm1179_vm4, %v3010_v49, 0.0  ;;  %v1225_v55 = vrot.slane %v1224_v51, 1  ;;  %v1308_v57 = vrot.slane %v1307_v56, 4  ;;  %v1296_v13 = vrot.slane %v1295_v3, 2 }
  0xb9   :  { %2390 = vmatpush3.bf16.msra.mxu1 %v2561_v52  ;;  %v1232_v19 = vrot.slane %v1231_v15, 1  ;;  %v1314_v63 = vsel %vm1179_vm4, %v3012_v46, 0.0  ;;  %v2577_v52 = vld [vmem:[#allocation8 + $0x120] sm:$0xff]   ;;  %v1301_v2 = vrot.slane %v1300_v62, 4  ;;  %v1328_v40 = vrot.slane %v3012_v46, 1  ;;  %v2589_v46 = vld [vmem:[#allocation8 + $0x138] sm:$0xff]  }
  0xba   :  { %2391 = vmatprep.subr.bf16.mxu1 %v2564_v8  ;;  %v1239_v8 = vrot.slane %v1238_v9, 1  ;;  %v1297_v21 = vadd.f32 %v1296_v13, %v1295_v3  ;;  %v1327_v44 = vrot.slane %v3007_v38, 1  ;;  %v2597_v3 = vld [vmem:[#allocation8 + $0x190] sm:$0xff]  }
  0xbb   :  { %2370 = vmatpush3.bf16.msra.mxu0 %v2563_v4  ;;  %v1233_v23 = vadd.f32 %v1232_v19, %v1231_v15  ;;  %v1315_v4 = vrot.slane %v1314_v63, 4  ;;  %v1302_v7 = vadd.f32 %v1301_v2, %v1300_v62  ;;  %v2581_v15 = vld [vmem:[#allocation8 + $0x128] sm:$0xff]   ;;  %v2584_v19 = vld [vmem:[#allocation8 + $0x170] sm:$0xff]   ;;  %v1354_v35 = vsel %vm1179_vm4, %v1328_v40, 0.0 }
  0xbc   :  { %2371 = vmatprep.subr.bf16.mxu0 %v2566_v10  ;;  %v2580_v10 = vld [vmem:[#allocation8 + $0x168] sm:$0xff]   ;;  %v1240_v20 = vadd.f32 %v1239_v8, %v1238_v9  ;;  %v1298_v41 = vrot.slane %v1297_v21, 1  ;;  %v2596_v2 = vld [vmem:[#allocation8 + $0x1d0] sm:$0xff]  }
  0xbd   :  { %2392 = vmatpush3.bf16.msra.mxu1 %v2565_v12  ;;  %v1374_v43 = vsel %vm307_vm1, %v1247_v47, %v1233_v23  ;;  %v1316_v11 = vadd.f32 %v1315_v4, %v1314_v63  ;;  %v2582_v12 = vld [vmem:[#allocation8 + $0xf0] sm:$0xff]   ;;  %v1303_v18 = vrot.slane %v1302_v7, 2  ;;  %v2588_v47 = vld [vmem:[#allocation8 + $0x178] sm:$0xff]  }
  0xbe   :  { %2393 = vmatprep.subr.bf16.mxu1 %v2568_v17  ;;  %v1396_v5 = vpack.c.bf16 %v1374_v43, %v1374_v43  ;;  %v1226_v17 = vadd.f32 %v1225_v55, %v1224_v51 }
  0xbf   :  { %2372 = vmatpush3.bf16.msra.mxu0 %v2567_v14  ;;  %v1309_v14 = vadd.f32 %v1308_v57, %v1307_v56  ;;  %v1304_v6 = vadd.f32 %v1303_v18, %v1302_v7  ;;  %v2600_v18 = vld [vmem:[#allocation8 + $0x1e0] sm:$0xff]  }
  0xc0   :  { %2373 = vmatprep.subr.bf16.mxu0 %v2570_v59  ;;  %1992 = vmatprep.mubr.bf16.mxu0 %v1396_v5  ;;  %v1317_v59 = vrot.slane %v1316_v11, 2  ;;  %v1373_v28 = vsel %vm307_vm1, %v1240_v20, %v1226_v17  ;;  %v2593_v5 = vld [vmem:[#allocation8 + $0x180] sm:$0xff]  }
  0xc1   :  { %2394 = vmatpush3.bf16.msra.mxu1 %v2569_v33  ;;  %v1310_v33 = vrot.slane %v1309_v14, 2  ;;  %v1305_v25 = vrot.slane %v1304_v6, 1 }
  0xc2   :  { %2395 = vmatprep.subr.bf16.mxu1 %v2572_v37  ;;  %v1318_v22 = vadd.f32 %v1317_v59, %v1316_v11  ;;  %v1299_v37 = vadd.f32 %v1298_v41, %v1297_v21  ;;  %v2598_v11 = vld [vmem:[#allocation8 + $0x1d8] sm:$0xff]   ;;  %v2601_v59 = vld [vmem:[#allocation8 + $0x1a0] sm:$0xff]   ;;  %v2602_v21 = vld [vmem:[#allocation8 + $0x1e8] sm:$0xff]  }
  0xc3   :  { %2374 = vmatpush3.bf16.msra.mxu0 %v2571_v34  ;;  %v1326_v34 = vrot.slane %v3010_v49, 1  ;;  %v1311_v23 = vadd.f32 %v1310_v33, %v1309_v14  ;;  %v1306_v29 = vadd.f32 %v1305_v25, %v1304_v6  ;;  %v1355_v49 = vrot.slane %v1354_v35, 4  ;;  %v2599_v14 = vld [vmem:[#allocation8 + $0x198] sm:$0xff]   ;;  %v2603_v33 = vld [vmem:[#allocation8 + $0x1a8] sm:$0xff]  }
  0xc4   :  { %2375 = vmatprep.subr.bf16.mxu0 %v2574_v36  ;;  %v1319_v26 = vrot.slane %v1318_v22, 1  ;;  %v2607_v25 = vld [vmem:[#allocation8 + $0x1b8] sm:$0xff]  }
  0xc5   :  { %2396 = vmatpush3.bf16.msra.mxu1 %v2573_v0  ;;  %v1312_v50 = vrot.slane %v1311_v23, 1  ;;  %v1340_v36 = vsel %vm1179_vm4, %v1326_v34, 0.0  ;;  %v1356_v56 = vadd.f32 %v1355_v49, %v1354_v35 }
  0xc6   :  { %2397 = vmatprep.subr.bf16.mxu1 %v2576_v42  ;;  %v1320_v30 = vadd.f32 %v1319_v26, %v1318_v22  ;;  %v1341_v0 = vrot.slane %v1340_v36, 4  ;;  %v1395_v42 = vpack.c.bf16 %v1373_v28, %v1373_v28  ;;  %v2604_v22 = vld [vmem:[#allocation8 + $0x1f0] sm:$0xff]  }
  0xc7   :  { %2376 = vmatpush3.bf16.msra.mxu0 %v2575_v32  ;;  %v1313_v31 = vadd.f32 %v1312_v50, %v1311_v23  ;;  %v1325_v32 = vrot.slane %v3002_v61, 1  ;;  %v1357_v63 = vrot.slane %v1356_v56, 2 }
  0xc8   :  { %2377 = vmatprep.subr.bf16.mxu0 %v2578_v60  ;;  %v1382_v45 = vsel %vm307_vm1, %v1320_v30, %v1306_v29  ;;  %v1342_v48 = vadd.f32 %v1341_v0, %v1340_v36  ;;  %v1347_v60 = vsel %vm1179_vm4, %v1327_v44, 0.0 }
  0xc9   :  { %2398 = vmatpush3.bf16.msra.mxu1 %v2577_v52  ;;  %v1398_v43 = vpack.c.bf16 %v1382_v45, %v1382_v45  ;;  %v1381_v51 = vsel %vm307_vm1, %v1313_v31, %v1299_v37  ;;  %v1333_v38 = vsel %vm1179_vm4, %v1325_v32, 0.0  ;;  %v1348_v55 = vrot.slane %v1347_v60, 4  ;;  %v2109_v37 = vld [vmem:[%s3056_s3] ss:$0 sm:$0xff] }
  0xca   :  { %2399 = vmatprep.subr.bf16.mxu1 %v2580_v10  ;;  %v1343_v61 = vrot.slane %v1342_v48, 2  ;;  %v1397_v9 = vpack.c.bf16 %v1381_v51, %v1381_v51  ;;  %v1334_v52 = vrot.slane %v1333_v38, 4  ;;  %v1358_v57 = vadd.f32 %v1357_v63, %v1356_v56 }
  0xcb   :  { %2378 = vmatpush3.bf16.msra.mxu0 %v2579_v58  ;;  %2032 = vmatprep.mubr.bf16.mxu1 %v1398_v43  ;;  %v1349_v7 = vadd.f32 %v1348_v55, %v1347_v60 }
  0xcc   :  { %2379 = vmatprep.subr.bf16.mxu0 %v2582_v12  ;;  %v1344_v62 = vadd.f32 %v1343_v61, %v1342_v48  ;;  %v1359_v8 = vrot.slane %v1358_v57, 1  ;;  %v1335_v10 = vadd.f32 %v1334_v52, %v1333_v38 }
  0xcd   :  { %2400 = vmatpush3.bf16.msra.mxu1 %v2581_v15  ;;  %v1350_v17 = vrot.slane %v1349_v7, 2 }
  0xce   :  { %2401 = vmatprep.subr.bf16.mxu1 %v2584_v19  ;;  %v1345_v4 = vrot.slane %v1344_v62, 1  ;;  %v1360_v12 = vadd.f32 %v1359_v8, %v1358_v57  ;;  %v2182_v57 = vld [vmem:[%s3058_s5] ss:$0 sm:$0xff]  ;;  %s2098_s5 = sshll.u32 %s2736_s23, 4  ;;  %s2099_s5 = int_to_ptr.vmem [resolvable:$true] %s2098_s5 }
  0xcf   :  { %2380 = vmatpush3.bf16.msra.mxu0 %v2583_v16  ;;  %v1336_v16 = vrot.slane %v1335_v10, 2  ;;  %v1351_v20 = vadd.f32 %v1350_v17, %v1349_v7  ;;  %s2696_s25 = scalar_lea.vmem %s2099_s5, 64  ;;  %p2701_p5 = scmp.lt.s32.totalorder %s2099_s5, %s2099_s5 }
  0xd0   :  { %2381 = vmatprep.subr.bf16.mxu0 %v2586_v39  ;;  %v1346_v58 = vadd.f32 %v1345_v4, %v1344_v62  ;;  %v2605_v39 = vld [vmem:[#allocation8 + $0x1b0] sm:$0xff]   ;;  %p2697_p4 = scmp.ne.s32.totalorder %s2099_s5, %s2696_s25  ;;  %p2702_p6 = scmp.lt.s32.totalorder %s2696_s25, %s2696_s25 }
  0xd1   :  { %2402 = vmatpush3.bf16.msra.mxu1 %v2585_v24  ;;  %v1337_v19 = vadd.f32 %v1336_v16, %v1335_v10  ;;  %v1352_v6 = vrot.slane %v1351_v20, 1  ;;  %v2606_v24 = vld [vmem:[#allocation8 + $0x1f8] sm:$0xff]  }
  0xd2   :  { %2403 = vmatprep.subr.bf16.mxu1 %v2588_v47  ;;  %v1390_v13 = vsel %vm307_vm1, %v1360_v12, %v1346_v58  ;;  %p2703_p7 = por %p2702_p6, %p2701_p5 }
  0xd3   :  { %2382 = vmatpush3.bf16.msra.mxu0 %v2587_v27  ;;  %v1400_v15 = vpack.c.bf16 %v1390_v13, %v1390_v13  ;;  %v1338_v34 = vrot.slane %v1337_v19, 1  ;;  %v1353_v23 = vadd.f32 %v1352_v6, %v1351_v20 }
  0xd4   :  { %2411 = vmatprep.subr.bf16.mxu0 %v2590_v53  ;;  %p2704_p8 = pnand %p2703_p7, %p2697_p4 }
  0xd5   :  { %2404 = vmatpush3.bf16.msra.mxu1 %v2589_v46  ;;  %v1339_v41 = vadd.f32 %v1338_v34, %v1337_v19 }
  0xd6   :  { %1993 = vmatmul.mubr.bf16.vlgmr.msra.gmra.mrb[12].mxu0 %v1395_v42 }
  0xd7   :  { %2412 = vmatpush3.bf16.msra.mxu0 %v2593_v5  ;;  %2072 = vmatprep.mubr.bf16.mxu0 %v1400_v15  ;;  %v1389_v26 = vsel %vm307_vm1, %v1353_v23, %v1339_v41 }
  0xd8   :  { %2413 = vmatprep.subr.bf16.mxu0 %v2594_v54  ;;  %2033 = vmatmul.mubr.bf16.vlgmr.msra.gmra.mrb[12].mxu1 %v1397_v9  ;;  %v1399_v27 = vpack.c.bf16 %v1389_v26, %v1389_v26 }
  0xdb   :  { %2414 = vmatpush3.bf16.msra.mxu0 %v2595_v1 }
  0xdc   :  { %2415 = vmatprep.subr.bf16.mxu0 %v2596_v2 }
  0xdf   :  { %2416 = vmatpush3.bf16.msra.mxu0 %v2597_v3 }
  0xe0   :  { %2417 = vmatprep.subr.bf16.mxu0 %v2598_v11 }
  0xe3   :  { %2418 = vmatpush3.bf16.msra.mxu0 %v2599_v14 }
  0xe4   :  { %2419 = vmatprep.subr.bf16.mxu0 %v2600_v18 }
  0xe7   :  { %2420 = vmatpush3.bf16.msra.mxu0 %v2601_v59 }
  0xe8   :  { %2421 = vmatprep.subr.bf16.mxu0 %v2602_v21 }
  0xeb   :  { %2422 = vmatpush3.bf16.msra.mxu0 %v2603_v33 }
  0xec   :  { %2423 = vmatprep.subr.bf16.mxu0 %v2604_v22 }
  0xef   :  { %2424 = vmatpush3.bf16.msra.mxu0 %v2605_v39 }
  0xf0   :  { %2425 = vmatprep.subr.bf16.mxu0 %v2606_v24 }
  0xf3   :  { %2426 = vmatpush3.bf16.msra.mxu0 %v2607_v25 }
  0xf6   :  { %2073 = vmatmul.mubr.bf16.vlgmr.msra.gmra.mrb[16].mxu0 %v1399_v27 }
 0x149   :  { %v2264_v28 = vpop.f32.mrb[0].mxu0 }
 0x14a   :  { %v2265_v50 = vpop.f32.mrb[1].mxu0 }
 0x14b   :  { %v2266_v29 = vadd.f32 %v2265_v50, %v2264_v28  ;;  %v2267_v30 = vpop.f32.mrb[2].mxu0  ;;  %v2286_v47 = vpop.f32.mrb[0].mxu1 }
 0x14c   :  { %v2268_v40 = vpop.f32.mrb[3].mxu0  ;;  %v2287_v53 = vpop.f32.mrb[1].mxu1 }
 0x14d   :  { %v969_v36 = vadd.f32 %v2266_v29, %v2109_v37  ;;  %v2288_v31 = vadd.f32 %v2287_v53, %v2286_v47  ;;  %v2289_v0 = vpop.f32.mrb[2].mxu1 }
 0x14e   :  { %v2290_v32 = vpop.f32.mrb[3].mxu1 }
 0x14f   :  { %v1009_v44 = vadd.f32 %v2288_v31, %v969_v36 }
 0x169   :  { %v2308_v45 = vpop.f32.mrb[4].mxu0 }
 0x16a   :  { %v2309_v35 = vpop.f32.mrb[5].mxu0 }
 0x16b   :  { %v2310_v42 = vadd.f32 %v2309_v35, %v2308_v45  ;;  %v2311_v43 = vpop.f32.mrb[6].mxu0  ;;  %v2330_v46 = vpop.f32.mrb[4].mxu1 }
 0x16c   :  { %v2312_v48 = vpop.f32.mrb[7].mxu0  ;;  %v2331_v5 = vpop.f32.mrb[5].mxu1 }
 0x16d   :  { %v1049_v49 = vadd.f32 %v2310_v42, %v1009_v44  ;;  %v2332_v51 = vadd.f32 %v2331_v5, %v2330_v46  ;;  %v2333_v54 = vpop.f32.mrb[6].mxu1 }
 0x16e   :  { %v2334_v61 = vpop.f32.mrb[7].mxu1 }
 0x16f   :  { %v1089_v56 = vadd.f32 %v2332_v51, %v1049_v49 }
 0x189   :  { %v1128_v38 = vpop.f32.mrb[8].mxu0 }
 0x18a   :  { %v1129_v60 = vadd.f32 %v1128_v38, %v1089_v56  ;;  %v2451_v9 = vpop.f32.mrb[9].mxu0 }
 0x18b   :  { %v1131_v62 = vpop.f32.mrb[10].mxu0  ;;  %v2361_v1 = vpop.f32.mrb[8].mxu1 }
 0x18c   :  { %v2452_v63 = vpop.f32.mrb[11].mxu0  ;;  %v2362_v52 = vpop.f32.mrb[9].mxu1 }
 0x18d   :  { %v2363_v55 = vadd.f32 %v2362_v52, %v2361_v1  ;;  %v2364_v2 = vpop.f32.mrb[10].mxu1 }
 0x18e   :  { %v2365_v4 = vpop.f32.mrb[11].mxu1 }
 0x18f   :  { %v1955_v58 = vadd.f32 %v2363_v55, %v2182_v57 }
 0x1a9   :  { %v2383_v8 = vpop.f32.mrb[12].mxu0 }
 0x1aa   :  { %v2384_v3 = vpop.f32.mrb[13].mxu0 }
 0x1ab   :  { %v2385_v10 = vadd.f32 %v2384_v3, %v2383_v8  ;;  %v2386_v7 = vpop.f32.mrb[14].mxu0  ;;  %v2405_v13 = vpop.f32.mrb[12].mxu1 }
 0x1ac   :  { %v2387_v11 = vpop.f32.mrb[15].mxu0  ;;  %v2406_v14 = vpop.f32.mrb[13].mxu1 }
 0x1ad   :  { %v1995_v12 = vadd.f32 %v2385_v10, %v1955_v58  ;;  %v2407_v15 = vadd.f32 %v2406_v14, %v2405_v13  ;;  %v2408_v16 = vpop.f32.mrb[14].mxu1 }
 0x1ae   :  { %v2409_v17 = vpop.f32.mrb[15].mxu1 }
 0x1af   :  { %v2035_v18 = vadd.f32 %v2407_v15, %v1995_v12 }
 0x1c9   :  { %v2427_v59 = vpop.f32.mrb[16].mxu0 }
 0x1ca   :  { %v2428_v19 = vpop.f32.mrb[17].mxu0 }
 0x1cb   :  { %v2429_v20 = vadd.f32 %v2428_v19, %v2427_v59  ;;  %v2430_v21 = vpop.f32.mrb[18].mxu0 }
 0x1cc   :  { %v2431_v33 = vpop.f32.mrb[19].mxu0 }
 0x1cd   :  { %v2075_v34 = vadd.f32 %v2429_v20, %v2035_v18 }
 0x1cf   :  { %v2082_v6 = vcombine.low %v1129_v60, %v2075_v34 }
 0x1d1   :  { %2247 = vst.sshfl [vmem:[#allocation10] sm:$0x33 pattern:$0x76325410] %v2082_v6 }
 0x1d2   :  { %2707 = shalt.err (!%p2704_p8)
}
 0x1d3   :  { %s2708_s28 = scalar_lea.hbm %s3059_s6, 64 }
 0x1d4   :  { %p2709_p9 = scmp.ne.s32.totalorder %s3059_s6, %s2708_s28  ;;  %p2712_p10 = scmp.lt.u32.totalorder %s2708_s28, %s3059_s6 }
 0x1d6   :  { %p2714_p11 = pnand %p2712_p10, %p2709_p9 }
 0x1d8   :  { %2717 = shalt.err (!%p2714_p11)
}
 0x1d9   :  { %2101 = dma.vmem_to_hbm [thread:$0]  %s2099_s5, 64, %s3059_s6, [#allocation4]  }
 0x1da   :  { %2724 = dma.done.wait [#allocation4], 64  }
 0x1db   :  { %2725 = vsyncadd [#allocation4], 4294967232 }
 0x1dc   :  { %2105 = vsyncpa [#allocation3], 1 }
 0x1dd   :  { %2106 = vsyncpa [#allocation6], 1 }
 0x1de   :  { %2107 = vsyncpa [#allocation9], 1 }
 0x1df   :  { %2108 = vsyncpa [#allocation4], 1 }

</bundles_post_ra>
